<compile_context>
chip_gen: v7x
topology: tpu7x:2x2x1
jax: 0.10.0
libtpu: 0.0.40
codegen_flags: <defaults>
</compile_context>

<pallas_src>
import jax
import jax.numpy as jnp
from jax.experimental import pallas as pl
from jax.experimental.pallas import tpu as pltpu


def _fake_quant(v, inv_scale, scale, zp, qmin, qmax):
    # affine quantize-dequantize with precomputed inverse scale:
    #   (clamp(round(v * inv_s) + zp, qmin, qmax) - zp) * s
    return (jnp.clip(jnp.round(v * inv_scale) + zp, qmin, qmax) - zp) * scale


def _amp_kernel(qp_ref, dims_ref, x_ref, w_ref, b_ref, y_ref, noise_ref):
    # qp_ref   (SMEM f32[8]): [act_inv_s, act_s, act_zp, out_inv_s, out_s, out_zp, w_inv_s, w_s]
    # dims_ref (SMEM i32[2]): [M_valid, N_valid]  (un-padded sizes, for the noise mask)
    i = pl.program_id(0)   # M-tile index ("parallel")
    j = pl.program_id(1)   # N-tile index ("arbitrary": noise accumulates across it)

    act_inv_s, act_s, act_zp = qp_ref[0], qp_ref[1], qp_ref[2]
    out_inv_s, out_s, out_zp = qp_ref[3], qp_ref[4], qp_ref[5]
    w_inv_s, w_s = qp_ref[6], qp_ref[7]
    m_valid, n_valid = dims_ref[0], dims_ref[1]

    x = x_ref[...].astype(jnp.float32)        # (tm, K)  f32
    w = w_ref[...]                            # (K, tn)  compute dtype (f32 or bf16)
    b = b_ref[...].astype(jnp.float32)        # (1, tn)  f32
    cd = w.dtype                              # matmul operand dtype

    # ---- float path:  y = x @ W.T + b ----
    y = jnp.dot(x.astype(cd), w, preferred_element_type=jnp.float32) + b

    # ---- fake-quant path:  out_ob(linear_fq(act_ob(x))) ----
    xq = _fake_quant(x, act_inv_s, act_s, act_zp, 0.0, 255.0)
    # fake-quantized weight recomputed in-kernel (symmetric int8, zp = 0);
    # avoids streaming a second full-precision weight copy from HBM.
    wq = jnp.clip(jnp.round(w.astype(jnp.float32) * w_inv_s), -127.0, 127.0) * w_s
    yq = jnp.dot(xq.astype(cd), wq.astype(cd), preferred_element_type=jnp.float32) + b
    quant_y = _fake_quant(yq, out_inv_s, out_s, out_zp, 0.0, 255.0)

    y_ref[...] = y.astype(y_ref.dtype)

    # ---- noise partials: masked (padding excluded) squared error folded into a
    #      lane-dense (8, 128) accumulator per M-block.  Both reductions below
    #      are over non-minor axes -> plain vector adds (no XLU cross-lane work),
    #      and the accumulation is on a VMEM output block, not SMEM RMW.
    tm, tn = y.shape
    row = jax.lax.broadcasted_iota(jnp.int32, (tm, 1), 0) + i * tm
    col = jax.lax.broadcasted_iota(jnp.int32, (1, tn), 1) + j * tn
    mask = jnp.logical_and(row < m_valid, col < n_valid)
    diff = jnp.where(mask, y - quant_y, 0.0)
    d2 = diff * diff
    part = d2.reshape(tm, tn // 128, 128).sum(axis=1)      # (tm, 128)
    part = part.reshape(tm // 8, 8, 128).sum(axis=0)       # (8, 128)

    @pl.when(j == 0)
    def _():
        noise_ref[...] = jnp.zeros_like(noise_ref)

    noise_ref[...] += part


def _round_up(v, m):
    return (v + m - 1) // m * m


def amp_forward(x, weight, bias, act_scale, act_zp, out_scale, out_zp,
                w_scale, noise_buf, *, tm=256, tn=256,
                compute_dtype=jnp.float32):
    """Pallas implementation of AmpModule.forward for a wrapped nn.Linear.

    x:      (M, K) float32
    weight: (N, K) float32   (PyTorch Linear layout)
    bias:   (N,)   float32
    Returns (y, new_noise_buf)  -- functional form of self.noise.copy_(noise + mse).
    """
    M, K = x.shape
    N = weight.shape[0]
    assert tm % 8 == 0 and tn % 128 == 0, "tm must be a multiple of 8, tn of 128"

    Mp, Np = _round_up(M, tm), _round_up(N, tn)
    gm, gn = Mp // tm, Np // tn

    # ---- parameter / layout setup (plain JAX glue) ----
    w_t = weight.T.astype(compute_dtype)                       # (K, N)
    x_p = jnp.pad(x, ((0, Mp - M), (0, 0)))
    w_p = jnp.pad(w_t, ((0, 0), (0, Np - N)))
    b_p = jnp.pad(bias.astype(jnp.float32), (0, Np - N)).reshape(1, Np)

    qparams = jnp.stack([
        1.0 / act_scale, act_scale, act_zp,
        1.0 / out_scale, out_scale, out_zp,
        1.0 / w_scale, w_scale,
    ]).astype(jnp.float32)
    dims = jnp.array([M, N], dtype=jnp.int32)

    # ---- VMEM budget (double-buffered blocks), capped for v7x's 64 MiB ----
    w_item = jnp.dtype(compute_dtype).itemsize
    est_vmem = 2 * (tm * K * 4            # x tile (f32)
                    + K * tn * w_item     # weight tile
                    + tm * tn * 4         # y tile
                    + 8 * tn * 4          # bias tile (sublane padded)
                    + 8 * 128 * 4)        # noise partial block
    if est_vmem > 56 * 2 ** 20:
        raise ValueError("tile config exceeds the v7x-safe VMEM budget; "
                         "reduce tm/tn (or add a K grid axis with an f32 accumulator)")
    vmem_limit = int(min(max(est_vmem + 16 * 2 ** 20, 32 * 2 ** 20), 56 * 2 ** 20))

    # TODO(synk): for very large K, add a K grid axis + f32 accumulator scratch;
    # this version keeps the full K contraction in a single block.
    y_p, noise_part = pl.pallas_call(
        _amp_kernel,
        out_shape=(
            jax.ShapeDtypeStruct((Mp, Np), jnp.float32),
            jax.ShapeDtypeStruct((gm * 8, 128), jnp.float32),
        ),
        grid_spec=pltpu.PrefetchScalarGridSpec(
            num_scalar_prefetch=0,
            grid=(gm, gn),
            in_specs=[
                pl.BlockSpec(memory_space=pltpu.SMEM),          # qparams  f32[8]
                pl.BlockSpec(memory_space=pltpu.SMEM),          # dims     i32[2]
                pl.BlockSpec((tm, K), lambda i, j: (i, 0)),     # x tile (resident across j)
                pl.BlockSpec((K, tn), lambda i, j: (0, j)),     # float weight tile
                pl.BlockSpec((1, tn), lambda i, j: (0, j)),     # bias tile
            ],
            out_specs=[
                pl.BlockSpec((tm, tn), lambda i, j: (i, j)),    # y
                pl.BlockSpec((8, 128), lambda i, j: (i, 0)),    # per-M-block noise partials
            ],
        ),
        compiler_params=pltpu.CompilerParams(
            dimension_semantics=("parallel", "arbitrary"),
            vmem_limit_bytes=vmem_limit,
        ),
    )(qparams, dims, x_p, w_p, b_p)

    y = y_p[:M, :N]
    mse = jnp.sum(noise_part) / jnp.float32(M * N)
    new_noise = noise_buf + mse                                 # self.noise.copy_(self.noise + noise)
    return y, new_noise


def _reference(x, weight, bias, act_scale, act_zp, out_scale, out_zp, w_scale,
               noise_buf, compute_dtype=jnp.float32):
    """Pure-JAX reference mirroring the kernel's dtype/cast points exactly."""
    cd = compute_dtype
    hi = jax.lax.Precision.HIGHEST
    w_t = weight.T.astype(cd)
    y = jnp.dot(x.astype(cd), w_t, precision=hi,
                preferred_element_type=jnp.float32) + bias
    xq = _fake_quant(x, 1.0 / act_scale, act_scale, act_zp, 0.0, 255.0)
    wq = jnp.clip(jnp.round(w_t.astype(jnp.float32) * (1.0 / w_scale)),
                  -127.0, 127.0) * w_scale
    yq = jnp.dot(xq.astype(cd), wq.astype(cd), precision=hi,
                 preferred_element_type=jnp.float32) + bias
    quant_y = _fake_quant(yq, 1.0 / out_scale, out_scale, out_zp, 0.0, 255.0)
    noise = jnp.mean((y - quant_y) ** 2)
    return y, noise_buf + noise


if __name__ == "__main__":
    key = jax.random.PRNGKey(0)
    kx, kw, kb = jax.random.split(key, 3)

    # Small but non-trivial shapes: multi-block grid in both M and N, with M
    # and N deliberately NOT multiples of the tiles (exercises padding + mask).
    M, K, N = 200, 256, 384
    x = jax.random.normal(kx, (M, K), dtype=jnp.float32)
    weight = jax.random.normal(kw, (N, K), dtype=jnp.float32) * 0.1
    bias = jax.random.normal(kb, (N,), dtype=jnp.float32) * 0.1

    # Simulated pre-calibrated observer state (observe=False, fake_quant=True).
    x_min, x_max = jnp.min(x), jnp.max(x)
    act_scale = (x_max - x_min) / 255.0            # asymmetric uint8 activation observer
    act_zp = jnp.round(-x_min / act_scale)
    w_scale = jnp.max(jnp.abs(weight)) / 127.0     # symmetric int8 weight observer
    y_cal = x @ weight.T + bias                    # calibration pass for output observer
    y_min, y_max = jnp.min(y_cal), jnp.max(y_cal)
    out_scale = (y_max - y_min) / 255.0
    out_zp = jnp.round(-y_min / out_scale)

    noise_buf = jnp.float32(0.0)   # register_buffer('noise', torch.tensor(0.0))

    # --- exact-semantics f32 configuration ---
    y, new_noise = amp_forward(x, weight, bias, act_scale, act_zp, out_scale,
                               out_zp, w_scale, noise_buf, tm=128, tn=128)
    y = jax.block_until_ready(y)
    new_noise = jax.block_until_ready(new_noise)
    y_ref, noise_ref = _reference(x, weight, bias, act_scale, act_zp, out_scale,
                                  out_zp, w_scale, noise_buf)
    assert jnp.allclose(y, y_ref, atol=2e-3, rtol=2e-3), "y mismatch (f32)"
    assert jnp.allclose(new_noise, noise_ref, rtol=2e-2, atol=1e-6), "noise mismatch (f32)"

    # --- bf16 MXU fast path (v6e/v7x): bf16 operands, f32 accumulate/fake-quant/MSE ---
    y16, noise16 = amp_forward(x, weight, bias, act_scale, act_zp, out_scale,
                               out_zp, w_scale, noise_buf, tm=128, tn=128,
                               compute_dtype=jnp.bfloat16)
    y16 = jax.block_until_ready(y16)
    noise16 = jax.block_until_ready(noise16)
    y16_ref, noise16_ref = _reference(x, weight, bias, act_scale, act_zp,
                                      out_scale, out_zp, w_scale, noise_buf,
                                      compute_dtype=jnp.bfloat16)
    assert jnp.allclose(y16, y16_ref, atol=1e-2, rtol=1e-2), "y mismatch (bf16)"
    assert jnp.allclose(noise16, noise16_ref, rtol=5e-2, atol=1e-5), "noise mismatch (bf16)"

    print("KERNEL_OK")
</pallas_src>

<mosaic_0001>
module attributes {stable_mosaic.version = 11 : i64} {
  func.func @_amp_kernel(%arg0: i32, %arg1: i32, %arg2: memref<8xf32, #tpu.memory_space<smem>>, %arg3: memref<2xi32, #tpu.memory_space<smem>>, %arg4: memref<128x256xf32, #tpu.memory_space<vmem>>, %arg5: memref<256x128xf32, #tpu.memory_space<vmem>>, %arg6: memref<1x128xf32, #tpu.memory_space<vmem>>, %arg7: memref<128x128xf32, #tpu.memory_space<vmem>>, %arg8: memref<8x128xf32, #tpu.memory_space<vmem>>) attributes {dimension_semantics = [#tpu.dimension_semantics<parallel>, #tpu.dimension_semantics<arbitrary>], iteration_bounds = array<i64: 2, 3>, scalar_prefetch = 0 : i64, scratch_operands = 0 : i64, tpu.core_type = #tpu.core_type<tc>, window_params = [{transform_indices = @transform_0, window_bounds = array<i64: 8>}, {transform_indices = @transform_1, window_bounds = array<i64: 2>}, {transform_indices = @transform_2, window_bounds = array<i64: 128, 256>}, {transform_indices = @transform_3, window_bounds = array<i64: 256, 128>}, {transform_indices = @transform_4, window_bounds = array<i64: 1, 128>}, {transform_indices = @transform_5, window_bounds = array<i64: 128, 128>}, {transform_indices = @transform_6, window_bounds = array<i64: 8, 128>}]} {
    %c0 = arith.constant 0 : index
    %0 = memref.load %arg2[%c0] : memref<8xf32, #tpu.memory_space<smem>>
    %c1 = arith.constant 1 : index
    %1 = memref.load %arg2[%c1] : memref<8xf32, #tpu.memory_space<smem>>
    %c2 = arith.constant 2 : index
    %2 = memref.load %arg2[%c2] : memref<8xf32, #tpu.memory_space<smem>>
    %c3 = arith.constant 3 : index
    %3 = memref.load %arg2[%c3] : memref<8xf32, #tpu.memory_space<smem>>
    %c4 = arith.constant 4 : index
    %4 = memref.load %arg2[%c4] : memref<8xf32, #tpu.memory_space<smem>>
    %c5 = arith.constant 5 : index
    %5 = memref.load %arg2[%c5] : memref<8xf32, #tpu.memory_space<smem>>
    %c6 = arith.constant 6 : index
    %6 = memref.load %arg2[%c6] : memref<8xf32, #tpu.memory_space<smem>>
    %c7 = arith.constant 7 : index
    %7 = memref.load %arg2[%c7] : memref<8xf32, #tpu.memory_space<smem>>
    %c0_0 = arith.constant 0 : index
    %8 = memref.load %arg3[%c0_0] : memref<2xi32, #tpu.memory_space<smem>>
    %c1_1 = arith.constant 1 : index
    %9 = memref.load %arg3[%c1_1] : memref<2xi32, #tpu.memory_space<smem>>
    %c0_2 = arith.constant 0 : index
    %c0_3 = arith.constant 0 : index
    %10 = vector.load %arg4[%c0_2, %c0_3] : memref<128x256xf32, #tpu.memory_space<vmem>>, vector<128x256xf32>
    %c0_4 = arith.constant 0 : index
    %c0_5 = arith.constant 0 : index
    %11 = vector.load %arg5[%c0_4, %c0_5] : memref<256x128xf32, #tpu.memory_space<vmem>>, vector<256x128xf32>
    %c0_6 = arith.constant 0 : index
    %c0_7 = arith.constant 0 : index
    %12 = vector.load %arg6[%c0_6, %c0_7] : memref<1x128xf32, #tpu.memory_space<vmem>>, vector<1x128xf32>
    %cst = arith.constant dense<0.000000e+00> : vector<128x128xf32>
    %13 = tpu.matmul %10, %11, %cst {dimension_numbers = #tpu.dot_dimension_numbers<[1], [0], [0], [1], [0, 0, 1, 1], [], []>} : vector<128x256xf32>, vector<256x128xf32>, vector<128x128xf32> -> vector<128x128xf32>
    %14 = vector.broadcast %12 : vector<1x128xf32> to vector<128x128xf32>
    %15 = arith.addf %13, %14 : vector<128x128xf32>
    %16 = vector.broadcast %0 : f32 to vector<128x256xf32>
    %17 = arith.mulf %10, %16 : vector<128x256xf32>
    %18 = math.roundeven %17 : vector<128x256xf32>
    %19 = vector.broadcast %2 : f32 to vector<128x256xf32>
    %20 = arith.addf %18, %19 : vector<128x256xf32>
    %cst_8 = arith.constant 0.000000e+00 : f32
    %cst_9 = arith.constant 2.550000e+02 : f32
    %21 = vector.broadcast %cst_8 : f32 to vector<128x256xf32>
    %22 = arith.maximumf %21, %20 : vector<128x256xf32>
    %23 = vector.broadcast %cst_9 : f32 to vector<128x256xf32>
    %24 = arith.minimumf %23, %22 : vector<128x256xf32>
    %25 = vector.broadcast %2 : f32 to vector<128x256xf32>
    %26 = arith.subf %24, %25 : vector<128x256xf32>
    %27 = vector.broadcast %1 : f32 to vector<128x256xf32>
    %28 = arith.mulf %26, %27 : vector<128x256xf32>
    %29 = vector.broadcast %6 : f32 to vector<256x128xf32>
    %30 = arith.mulf %11, %29 : vector<256x128xf32>
    %31 = math.roundeven %30 : vector<256x128xf32>
    %cst_10 = arith.constant -1.270000e+02 : f32
    %cst_11 = arith.constant 1.270000e+02 : f32
    %32 = vector.broadcast %cst_10 : f32 to vector<256x128xf32>
    %33 = arith.maximumf %32, %31 : vector<256x128xf32>
    %34 = vector.broadcast %cst_11 : f32 to vector<256x128xf32>
    %35 = arith.minimumf %34, %33 : vector<256x128xf32>
    %36 = vector.broadcast %7 : f32 to vector<256x128xf32>
    %37 = arith.mulf %35, %36 : vector<256x128xf32>
    %cst_12 = arith.constant dense<0.000000e+00> : vector<128x128xf32>
    %38 = tpu.matmul %28, %37, %cst_12 {dimension_numbers = #tpu.dot_dimension_numbers<[1], [0], [0], [1], [0, 0, 1, 1], [], []>} : vector<128x256xf32>, vector<256x128xf32>, vector<128x128xf32> -> vector<128x128xf32>
    %39 = vector.broadcast %12 : vector<1x128xf32> to vector<128x128xf32>
    %40 = arith.addf %38, %39 : vector<128x128xf32>
    %41 = vector.broadcast %3 : f32 to vector<128x128xf32>
    %42 = arith.mulf %40, %41 : vector<128x128xf32>
    %43 = math.roundeven %42 : vector<128x128xf32>
    %44 = vector.broadcast %5 : f32 to vector<128x128xf32>
    %45 = arith.addf %43, %44 : vector<128x128xf32>
    %cst_13 = arith.constant 0.000000e+00 : f32
    %cst_14 = arith.constant 2.550000e+02 : f32
    %46 = vector.broadcast %cst_13 : f32 to vector<128x128xf32>
    %47 = arith.maximumf %46, %45 : vector<128x128xf32>
    %48 = vector.broadcast %cst_14 : f32 to vector<128x128xf32>
    %49 = arith.minimumf %48, %47 : vector<128x128xf32>
    %50 = vector.broadcast %5 : f32 to vector<128x128xf32>
    %51 = arith.subf %49, %50 : vector<128x128xf32>
    %52 = vector.broadcast %4 : f32 to vector<128x128xf32>
    %53 = arith.mulf %51, %52 : vector<128x128xf32>
    %c0_15 = arith.constant 0 : index
    %c0_16 = arith.constant 0 : index
    %54 = vector.load %arg7[%c0_15, %c0_16] : memref<128x128xf32, #tpu.memory_space<vmem>>, vector<128x128xf32>
    tpu.vector_store %arg7[%c0_15, %c0_16], %15 {strides = array<i32>} : memref<128x128xf32, #tpu.memory_space<vmem>>, vector<128x128xf32>,
    %55 = tpu.iota {dimensions = array<i32: 0>} : vector<128x1xi32>
    %c128_i32 = arith.constant 128 : i32
    %56 = arith.muli %arg0, %c128_i32 : i32
    %57 = vector.broadcast %56 : i32 to vector<128x1xi32>
    %58 = arith.addi %55, %57 : vector<128x1xi32>
    %59 = tpu.iota {dimensions = array<i32: 1>} : vector<1x128xi32>
    %c128_i32_17 = arith.constant 128 : i32
    %60 = arith.muli %arg1, %c128_i32_17 : i32
    %61 = vector.broadcast %60 : i32 to vector<1x128xi32>
    %62 = arith.addi %59, %61 : vector<1x128xi32>
    %63 = vector.broadcast %8 : i32 to vector<128x1xi32>
    %64 = arith.cmpi slt, %58, %63 : vector<128x1xi32>
    %65 = vector.broadcast %9 : i32 to vector<1x128xi32>
    %66 = arith.cmpi slt, %62, %65 : vector<1x128xi32>
    %67 = vector.broadcast %64 : vector<128x1xi1> to vector<128x128xi1>
    %68 = vector.broadcast %66 : vector<1x128xi1> to vector<128x128xi1>
    %69 = arith.andi %67, %68 : vector<128x128xi1>
    %70 = arith.subf %15, %53 : vector<128x128xf32>
    %cst_18 = arith.constant 0.000000e+00 : f32
    %71 = vector.broadcast %cst_18 : f32 to vector<128x128xf32>
    %72 = arith.select %69, %70, %71 : vector<128x128xi1>, vector<128x128xf32>
    %73 = arith.mulf %72, %72 : vector<128x128xf32>
    %74 = vector.shape_cast %73 : vector<128x128xf32> to vector<128x1x128xf32>
    %cst_19 = arith.constant dense<0.000000e+00> : vector<128x128xf32>
    %75 = vector.multi_reduction <add>, %74, %cst_19 [1] : vector<128x1x128xf32> to vector<128x128xf32>
    %76 = vector.shape_cast %75 : vector<128x128xf32> to vector<16x8x128xf32>
    %cst_20 = arith.constant dense<0.000000e+00> : vector<8x128xf32>
    %77 = vector.multi_reduction <add>, %76, %cst_20 [0] : vector<16x8x128xf32> to vector<8x128xf32>
    %c0_i32 = arith.constant 0 : i32
    %78 = arith.cmpi eq, %arg1, %c0_i32 : i32
    %79 = arith.extui %78 : i1 to i32
    %c0_i32_21 = arith.constant 0 : i32
    %80 = arith.cmpi ne, %79, %c0_i32_21 : i32
    scf.if %80 {
      %cst_26 = arith.constant 0.000000e+00 : f32
      %84 = vector.broadcast %cst_26 : f32 to vector<8x128xf32>
      %c0_27 = arith.constant 0 : index
      %c0_28 = arith.constant 0 : index
      %85 = vector.load %arg8[%c0_27, %c0_28] : memref<8x128xf32, #tpu.memory_space<vmem>>, vector<8x128xf32>
      tpu.vector_store %arg8[%c0_27, %c0_28], %84 {strides = array<i32>} : memref<8x128xf32, #tpu.memory_space<vmem>>, vector<8x128xf32>,
    } else {
    }
    %c0_22 = arith.constant 0 : index
    %c0_23 = arith.constant 0 : index
    %81 = vector.load %arg8[%c0_22, %c0_23] : memref<8x128xf32, #tpu.memory_space<vmem>>, vector<8x128xf32>
    %82 = arith.addf %81, %77 : vector<8x128xf32>
    %c0_24 = arith.constant 0 : index
    %c0_25 = arith.constant 0 : index
    %83 = vector.load %arg8[%c0_24, %c0_25] : memref<8x128xf32, #tpu.memory_space<vmem>>, vector<8x128xf32>
    tpu.vector_store %arg8[%c0_24, %c0_25], %82 {strides = array<i32>} : memref<8x128xf32, #tpu.memory_space<vmem>>, vector<8x128xf32>,
    return
  }
  func.func @transform_0(%arg0: i32, %arg1: i32) -> i32 {
    %c0_i32 = arith.constant 0 : i32
    %c0_i32_0 = arith.constant 0 : i32
    return %c0_i32 : i32
  }
  func.func @transform_1(%arg0: i32, %arg1: i32) -> i32 {
    %c0_i32 = arith.constant 0 : i32
    %c0_i32_0 = arith.constant 0 : i32
    return %c0_i32 : i32
  }
  func.func @transform_2(%arg0: i32, %arg1: i32) -> (i32, i32) {
    %c0_i32 = arith.constant 0 : i32
    %c0_i32_0 = arith.constant 0 : i32
    return %arg0, %c0_i32 : i32, i32
  }
  func.func @transform_3(%arg0: i32, %arg1: i32) -> (i32, i32) {
    %c0_i32 = arith.constant 0 : i32
    %c0_i32_0 = arith.constant 0 : i32
    return %c0_i32, %arg1 : i32, i32
  }
  func.func @transform_4(%arg0: i32, %arg1: i32) -> (i32, i32) {
    %c0_i32 = arith.constant 0 : i32
    %c0_i32_0 = arith.constant 0 : i32
    return %c0_i32, %arg1 : i32, i32
  }
  func.func @transform_5(%arg0: i32, %arg1: i32) -> (i32, i32) {
    %c0_i32 = arith.constant 0 : i32
    return %arg0, %arg1 : i32, i32
  }
  func.func @transform_6(%arg0: i32, %arg1: i32) -> (i32, i32) {
    %c0_i32 = arith.constant 0 : i32
    %c0_i32_0 = arith.constant 0 : i32
    return %arg0, %c0_i32 : i32, i32
  }
}

</mosaic_0001>

<bundles_post_ra>
// kernel: tpu_custom_call.1
= control target key start
LH: loop header
LB: loop body
LE: loop exit
PB: predicated region body
PF: predicated region fallthrough
CT: control target
= control target key end

     0   :  { %s3878_s0 = inlined_call_operand.hbm [shape: f32[8], index: 0, kind: input, shape index: {}]   ;;  %s3879_s1 = inlined_call_operand.vmem [shape: s32[2], index: 1, kind: input, shape index: {}]   ;;  %s3880_s2 = inlined_call_operand.hbm [shape: f32[256,256], index: 2, kind: input, shape index: {}]   ;;  %s3881_s3 = inlined_call_operand.hbm [shape: f32[256,384], index: 3, kind: input, shape index: {}]   ;;  %s3882_s4 = inlined_call_operand.vmem [shape: f32[1,384], index: 4, kind: input, shape index: {}]   ;;  %s3883_s5 = inlined_call_operand.hbm [shape: f32[256,384], index: 5, kind: output, shape index: {0}]   ;;  %s3884_s6 = inlined_call_operand.hbm [shape: f32[16,128], index: 6, kind: output, shape index: {1}]  }
   0x1   :  { %3910 = sst [smem:[#allocation32_spill]] %s3878_s0 }
   0x2   :  { %3911 = sst [smem:[#allocation33_spill]] %s3879_s1 }
   0x3   :  { %3912 = sst [smem:[#allocation34_spill]] %s3880_s2 }
   0x4   :  { %3913 = sst [smem:[#allocation35_spill]] %s3881_s3 }
   0x5   :  { %3914 = sst [smem:[#allocation36_spill]] %s3882_s4 }
   0x6   :  { %3915 = sst [smem:[#allocation37_spill]] %s3883_s5 }
   0x7   :  { %3916 = sst [smem:[#allocation38_spill]] %s3884_s6 }
   0x8   :  { %12 = vsyncpa [#allocation5], 0 }
   0x9   :  { %13 = vsyncpa [#allocation6], 0 }
   0xa   :  { %14 = vsyncpa [#allocation3], 0 }
   0xb   :  { %16 = vsyncpa [#allocation3 + $0x1], 0 }
   0xc   :  { %17 = vsyncpa [#allocation10], 0 }
   0xd   :  { %19 = vsyncpa [#allocation10 + $0x1], 0 }
   0xe   :  { %20 = vsyncpa [#allocation4], 0 }
   0xf   :  { %22 = vsyncpa [#allocation4 + $0x1], 0 }
  0x10   :  { %23 = vsyncpa [#allocation13], 0 }
  0x11   :  { %25 = vsyncpa [#allocation13 + $0x1], 0  ;;  %s2545_s21 = smov 0   ;;  %s2547_s22 = smov 0  }
  0x12   :  { %s2549_s23 = smov 0   ;;  %s2551_s24 = smov 0  }
  0x13   :  { %s2553_s25 = smov 0   ;;  %s2555_s26 = smov 0  }
  0x14   :  { %s2557_s27 = smov 0   ;;  %s2559_s28 = smov 0  }
  0x15   :  { %s2561_s29 = smov 0   ;;  %s2563_s30 = smov 0  }
  0x16   :  { %s2565_s7 = smov 0   ;;  %s2567_s8 = smov 0  }
  0x17   :  { %s2569_s9 = smov 0   ;;  %s2571_s10 = smov 0  }
  0x18 LB: > { %3917 = sst [smem:[#allocation20_spill]] %s2441_s21  ;;  %s1671_s11 = sadd.s32 4294967295, %s2493_s10   ;;  %s2493_s10 = sphi %s2571_s10, %s31_s10   ;;  %s2489_s9 = sphi %s2569_s9, %s3990_s9   ;;  %s2485_s8 = sphi %s2567_s8, %s3989_s8   ;;  %s2481_s7 = sphi %s2565_s7, %s3988_s7   ;;  %s2477_s30 = sphi %s2563_s30, %s4001_s30   ;;  %s2473_s29 = sphi %s2561_s29, %s4000_s29   ;;  %s2469_s28 = sphi %s2559_s28, %s3999_s28   ;;  %s2465_s27 = sphi %s2557_s27, %s3998_s27   ;;  %s2461_s26 = sphi %s2555_s26, %s3997_s26   ;;  %s2457_s25 = sphi %s2553_s25, %s3996_s25   ;;  %s2453_s24 = sphi %s2551_s24, %s3995_s24   ;;  %s2449_s23 = sphi %s2549_s23, %s3994_s23   ;;  %s2445_s22 = sphi %s2547_s22, %s3993_s22   ;;  %s2441_s21 = sphi %s2545_s21, %s3992_s21  }
  0x19   : > { %3918 = sst [smem:[#allocation21_spill]] %s2465_s27  ;;  %s1672_s12 = sadd.s32 4294967294, %s2493_s10  }
  0x1a   : > { %3919 = sst [smem:[#allocation22_spill]] %s2481_s7  ;;  %p105_p0 = scmp.ne.s32.totalorder %s2469_s28, %s2465_s27 }
  0x1b   : > { %3920 = sst [smem:[#allocation23_spill]] %s2485_s8  ;;  %p2617_p1 = scmp.eq.s32.totalorder %s1671_s11, 0 }
  0x1c   : > { %3921 = sst [smem:[#allocation24_spill]] %s2489_s9  ;;  %p131_p2 = scmp.ne.s32.totalorder %s2457_s25, %s2453_s24 }
  0x1d   : > { %s3922_s13 = scalar_select %p2617_p1, 1, 0 }
  0x1e   : > { %p2628_p3 = por %p2617_p1, %p105_p0  ;;  %p182_p4 = scmp.ne.s32.totalorder %s2449_s23, %s2445_s22 }
  0x1f   : > { %p2636_p5 = por %p131_p2, %p2617_p1  ;;  %p2640_p6 = scmp.eq.s32.totalorder %s1671_s11, 5 }
  0x20   : > { %s3923_s15 = scalar_select %p2628_p3, 1, 0 }
  0x21   : > { %s3924_s16 = scalar_select %p2636_p5, 1, 0 }
  0x22   : > { %p188_p7 = scmp.ne.s32.totalorder %s2445_s22, %s2441_s21  ;;  %p189_p8 = scmp.eq.s32.totalorder %s1672_s12, 5 }
  0x23   : > { %p2648_p9 = por %p2640_p6, %p182_p4  ;;  %p1673_p10 = scmp.ge.s32.totalorder %s2493_s10, 1 }
  0x24   : > { %p2653_p11 = por %p189_p8, %p188_p7  ;;  %p2660_p12 = por %p189_p8, %p105_p0 }
  0x25   : > { %s3926_s18 = scalar_select %p2648_p9, 1, 0 }
  0x26   : > { %s3928_s19 = scalar_select %p2653_p11, 1, 0 }
  0x27   : > { %3927 = sst [smem:[#allocation25_spill]] %s3926_s18  ;;  %p222_p13 = scmp.lt.s32.totalorder %s2493_s10, 7 }
  0x28   : > { %3929 = sst [smem:[#allocation26_spill]] %s3928_s19  ;;  %s3933_s1 = sld [smem:[#allocation33_spill]] }
  0x29   : > { %s3930_s20 = scalar_select %p2660_p12, 1, 0 }
  0x2a   : > { %p2665_p2 = pnand %p1673_p10, %p222_p13  ;;  %s3935_s0 = sld [smem:[#allocation32_spill]] }
  0x2b   : > { %3931 = sst [smem:[#allocation27_spill]] %s3930_s20 }
  0x2c   : > { %p2065_p4 = pneg %p2665_p2 }
  0x2e   : > { %s244_s14 = sshll.u32 %s3933_s1, 4  ;;  %p2676_p7 = pnand %p2065_p4, %p2617_p1  ;;  %s245_s14 = int_to_ptr.vmem [resolvable:$true] %s244_s14 }
  0x30   : > { %s2215_s5 = scalar_lea.hbm %s3935_s0, 16  ;;  %p2217_p10 = pneg %p2676_p7 }
  0x31   : > { %p2216_p8 = scmp.ne.s32.totalorder %s3935_s0, %s2215_s5  ;;  %p2222_p4 = scmp.lt.u32.totalorder %s2215_s5, %s3935_s0 }
  0x33   : > { %p2218_p13 = pnand %p2217_p10, %p2216_p8 }
  0x35   : > { %p2219_p12 = pneg %p2218_p13 }
  0x37   : > { %p2224_p11 = pnand %p2222_p4, %p2219_p12 }
  0x39   : > { %2227 = shalt.err (!%p2224_p11)
}
  0x3a   : > { %s2495_s19 = smov [#allocation2]   ;;  %s2228_s21 = scalar_lea.vmem %s245_s14, 16 }
  0x3b   : > { %2068 = dma.hbm_to_smem (!%p2676_p7), %s3935_s0, 16, %s2495_s19, [#allocation5]  }
  0x3c   : > { %p2229_p0 = scmp.ne.s32.totalorder %s245_s14, %s2228_s21  ;;  %p2236_p3 = scmp.lt.s32.totalorder %s245_s14, %s245_s14 }
  0x3d   : > { %p2237_p8 = scmp.lt.s32.totalorder %s2228_s21, %s2228_s21 }
  0x3e   : > { %p2231_p9 = pnand %p2229_p0, %p2217_p10 }
  0x3f   : > { %p2238_p13 = por %p2237_p8, %p2236_p3 }
  0x40   : > { %p2232_p5 = pneg %p2231_p9 }
  0x42   : > { %p2239_p1 = pnand %p2238_p13, %p2232_p5 }
  0x44   : > { %2242 = shalt.err (!%p2239_p1)
}
  0x45   : > { %s2496_s1 = smov [#allocation7]   ;;  %p3899_p9 = scmp.eq.s32.totalorder %s2493_s10, 0 }
  0x46   : > { %2071 = dma.vmem_to_smem (!%p2676_p7), %s245_s14, 16, %s2496_s1, [#allocation6]  }
  0x47   : > { %p3936_p11 = scmp.ne.s32.totalorder %s2473_s29, %s2469_s28  ;;  %p3898_p1 = scmp.lt.s32.totalorder %s2493_s10, 6 }
  0x48   : > { %s255_s27 = sand.u32 1, %s2473_s29   ;;  %s1743_s19 = sshll.u32 %s2489_s9, 12 }
  0x49   : > { %p2708_p3 = por %p2640_p6, %p3936_p11  ;;  %p3939_p5 = pmov %p3936_p11 }
  0x4a   : > { %s1677_s18 = sshll.u32 %s255_s27, 8  ;;  %s3940_s2 = sld [smem:[#allocation34_spill]] }
  0x4b   : > { %s3937_s5 = scalar_select %p2708_p3, 1, 0 }
  0x4c   : > { %p101_p12 = por %p3899_p9, %p3939_p5  ;;  %s259_s14 = scalar_lea.vmem [#allocation8], %s1677_s18 }
  0x4d   : > { %3938 = sst [smem:[#allocation28_spill]] %s3937_s5  ;;  %s267_s17 = sshll.u32 %s259_s14, 4  ;;  %s2731_s17 = int_to_ptr.vmem [resolvable:$true] %s267_s17 }
  0x4e   : > { %p2727_p6 = pnand %p3898_p1, %p101_p12  ;;  %s2733_s21 = scalar_lea.sflag [#allocation3], %s255_s27 }
  0x50   : > { %s2723_s12 = scalar_lea.hbm %s3940_s2, %s1743_s19  ;;  %p2245_p0 = pneg %p2727_p6 }
  0x51   : > { %s2243_s1 = scalar_lea.hbm %s2723_s12, 4096  ;;  %s2248_s20 = scalar_lea.hbm %s3940_s2, 8192 }
  0x52   : > { %p2244_p7 = scmp.ne.s32.totalorder %s2723_s12, %s2243_s1  ;;  %p2249_p8 = scmp.lt.u32.totalorder %s2723_s12, %s3940_s2 }
  0x53   : > { %p2250_p13 = scmp.lt.u32.totalorder %s2248_s20, %s2243_s1  ;;  %p2252_p5 = scmp.lt.u32.totalorder %s2243_s1, %s2723_s12 }
  0x54   : > { %p2246_p10 = pnand %p2245_p0, %p2244_p7 }
  0x55   : > { %p2251_p11 = por %p2250_p13, %p2249_p8 }
  0x56   : > { %p2247_p4 = pneg %p2246_p10 }
  0x57   : > { %p2253_p12 = por %p2252_p5, %p2251_p11 }
  0x59   : > { %p2254_p1 = pnand %p2253_p12, %p2247_p4 }
  0x5b   : > { %2257 = shalt.err (!%p2254_p1)
}
  0x5c   : > { %s2258_s27 = scalar_lea.vmem %s2731_s17, 4096  ;;  %s2497_s18 = smov [#allocation8]  }
  0x5d   : > { %p2259_p7 = scmp.ne.s32.totalorder %s2731_s17, %s2258_s27  ;;  %s2263_s19 = sshll.u32 %s2497_s18, 4  ;;  %s2264_s19 = int_to_ptr.vmem [resolvable:$false] %s2263_s19 }
  0x5e   : > { %s2265_s11 = scalar_lea.vmem %s2264_s19, 8192  ;;  %p2266_p3 = scmp.lt.s32.totalorder %s2731_s17, %s2264_s19 }
  0x5f   : > { %p2261_p10 = pnand %p2259_p7, %p2245_p0  ;;  %p2267_p8 = scmp.lt.s32.totalorder %s2265_s11, %s2258_s27 }
  0x61   : > { %p2262_p9 = pneg %p2261_p10  ;;  %p2268_p13 = por %p2267_p8, %p2266_p3 }
  0x63   : > { %p2269_p11 = pnand %p2268_p13, %p2262_p9 }
  0x65   : > { %2272 = shalt.err (!%p2269_p11)
}
  0x66   : > { %s2498_s1 = smov 256   ;;  %s2499_s20 = smov 16  }
  0x67   : > { %2075 = dma.hbm_to_vmem [thread:$0]  (!%p2727_p6), %s2723_s12, 4096, %s2731_s17, %s2733_s21, %s2498_s1, %s2498_s1, %s2499_s20  }
  0x68   : > { %s40_s14 = sadd.s32 1, %s2485_s8  ;;  %s118_s27 = sadd.s32 1, %s2461_s26 }
  0x69   : > { %p41_p9 = scmp.ge.s32.totalorder %s40_s14, 3  ;;  %p125_p3 = scmp.ne.s32.totalorder %s2461_s26, %s2457_s25 }
  0x6a   : > { %s277_s18 = sand.u32 1, %s2461_s26   ;;  %s1682_s19 = sshll.u32 %s2485_s8, 7 }
  0x6b   : > { %s4003_s14 = smov (%p41_p9, %s40_s14), 0  ;;  %s3943_s11 = sadd.s32 1, %s2489_s9 }
  0x6c   : > { %3942 = sst [smem:[#allocation29_spill]] %s4003_s14  ;;  %s4005_s11 = smov (!%p41_p9, %s3943_s11), %s2489_s9 }
  0x6d   : > { %s115_s0 = ssub.s32 %s2485_s8, %s4003_s14  ;;  %p3944_p1 = scmp.eq.s32.totalorder %s2493_s10, 0 }
  0x6e   : > { %p45_p0 = scmp.ge.s32.totalorder %s4005_s11, 2  ;;  %p116_p4 = scmp.eq.s32.totalorder %s115_s0, 0 }
  0x6f   : > { %p2776_p6 = por %p125_p3, %p3944_p1  ;;  %s1681_s17 = sshll.u32 %s277_s18, 8 }
  0x70   : > { %s4007_s11 = smov (%p45_p0, %s4005_s11), 0  ;;  %s3947_s3 = sld [smem:[#allocation35_spill]] }
  0x71   : > { %3946 = sst [smem:[#allocation30_spill]] %s4007_s11  ;;  %s89_s21 = ssub.s32 %s2489_s9, %s4007_s11 }
  0x72   : > { %s2783_s6 = scalar_select %p116_p4, %s2461_s26, %s118_s27  }
  0x73   : > { %p90_p5 = scmp.eq.s32.totalorder %s89_s21, 0  ;;  %s169_s1 = sor.u32 %s115_s0, %s89_s21 }
  0x74   : > { %p170_p12 = scmp.eq.s32.totalorder %s169_s1, 0  ;;  %s3948_s8 = sadd.s32 1, %s2473_s29 }
  0x75   : > { %s2795_s5 = scalar_select %p90_p5, %s2473_s29, %s3948_s8  }
  0x76   : > { %s2790_s14 = scalar_lea.hbm %s3947_s3, %s1682_s19  ;;  %s3950_s7 = sadd.s32 1, %s2449_s23 }
  0x77   : > { %3949 = sst [smem:[#allocation31_spill]] %s2795_s5  ;;  %s281_s27 = scalar_lea.vmem [#allocation9], %s1681_s17 }
  0x78   : > { %s2800_s4 = scalar_select %p170_p12, %s2449_s23, %s3950_s7  }
  0x79   : > { %s287_s11 = sshll.u32 %s281_s27, 4  ;;  %p3951_p7 = scmp.lt.s32.totalorder %s2493_s10, 6  ;;  %s2810_s11 = int_to_ptr.vmem [resolvable:$true] %s287_s11 }
  0x7a   : > { %s2812_s2 = scalar_lea.sflag [#allocation10], %s277_s18  ;;  %s2273_s8 = scalar_lea.hbm %s2790_s14, 4096 }
  0x7b   : > { %p2806_p10 = pnand %p3951_p7, %p2776_p6  ;;  %p2274_p8 = scmp.ne.s32.totalorder %s2790_s14, %s2273_s8 }
  0x7c   : > { %s2278_s12 = scalar_lea.hbm %s3947_s3, 12288  ;;  %p2279_p3 = scmp.lt.u32.totalorder %s2790_s14, %s3947_s3 }
  0x7d   : > { %p2275_p13 = pneg %p2806_p10  ;;  %p2280_p1 = scmp.lt.u32.totalorder %s2278_s12, %s2273_s8 }
  0x7e   : > { %p2282_p0 = scmp.lt.u32.totalorder %s2273_s8, %s2790_s14 }
  0x7f   : > { %p2276_p11 = pnand %p2275_p13, %p2274_p8  ;;  %p2281_p6 = por %p2280_p1, %p2279_p3 }
  0x81   : > { %p2277_p9 = pneg %p2276_p11  ;;  %p2283_p4 = por %p2282_p0, %p2281_p6 }
  0x83   : > { %p2284_p5 = pnand %p2283_p4, %p2277_p9 }
  0x85   : > { %2287 = shalt.err (!%p2284_p5)
}
  0x86   : > { %s2288_s18 = scalar_lea.vmem %s2810_s11, 4096  ;;  %s2500_s1 = smov [#allocation9]  }
  0x87   : > { %p2289_p12 = scmp.ne.s32.totalorder %s2810_s11, %s2288_s18  ;;  %s2293_s20 = sshll.u32 %s2500_s1, 4  ;;  %s2294_s20 = int_to_ptr.vmem [resolvable:$false] %s2293_s20 }
  0x88   : > { %s2295_s27 = scalar_lea.vmem %s2294_s20, 8192  ;;  %p2296_p11 = scmp.lt.s32.totalorder %s2810_s11, %s2294_s20 }
  0x89   : > { %p2291_p7 = pnand %p2289_p12, %p2275_p13  ;;  %p2297_p3 = scmp.lt.s32.totalorder %s2295_s27, %s2288_s18 }
  0x8b   : > { %p2292_p8 = pneg %p2291_p7  ;;  %p2298_p1 = por %p2297_p3, %p2296_p11 }
  0x8d   : > { %p2299_p6 = pnand %p2298_p1, %p2292_p8 }
  0x8f   : > { %2302 = shalt.err (!%p2299_p6)
}
  0x90   : > { %s2501_s8 = smov 384   ;;  %s2502_s7 = smov 128  }
  0x91   : > { %s2503_s19 = smov 8   ;;  %305 = sbr.rel (%p2665_p2) target bundleno = 577 (0x241), region = 40 }
  0x92   : > { %2078 = dma.hbm_to_vmem [thread:$0]  (!%p2806_p10), %s2790_s14, 4096, %s2810_s11, %s2812_s2, %s2501_s8, %s2502_s7, %s2503_s19  }
  0x93   : > { %p3953_p13 = scmp.ne.s32.totalorder (!%p2665_p2), %s3922_s13, 0 }
  0x98   : > { %2416 = dma.done.wait (%p3953_p13), [#allocation5], 16  }
  0x99   : > { %2418 = vsyncadd (%p3953_p13), [#allocation5], 4294967280 }
  0x9a   : > { %2420 = dma.done.wait (%p3953_p13), [#allocation6], 16  }
  0x9b   : > { %2422 = vsyncadd (%p3953_p13), [#allocation6], 4294967280  ;;  %s2851_s12 = sand.u32 1, %s2469_s28   ;;  %p3954_p2 = scmp.ne.s32.totalorder %s3923_s15, 0 }
  0x9c   : > { %s1686_s24 = sshll.u32 %s2851_s12, 8  ;;  %s316_s14 = scalar_lea.sflag [#allocation3], %s2851_s12 }
  0x9d   : > { %s2855_s11 = scalar_lea.vmem [#allocation8], %s1686_s24 }
  0x9e   : > { %2424 = dma.done.wait (%p3954_p2), %s316_s14, 4096  }
  0x9f   : > { %2426 = vsyncadd (%p3954_p2), %s316_s14, 4294963200  ;;  %s324_s0 = sand.u32 1, %s2457_s25   ;;  %p3955_p10 = scmp.ne.s32.totalorder %s3924_s16, 0 }
  0xa0   : > { %s1687_s13 = sshll.u32 %s324_s0, 8  ;;  %s325_s2 = scalar_lea.sflag [#allocation10], %s324_s0 }
  0xa1   : > { %s2862_s17 = scalar_lea.vmem [#allocation9], %s1687_s13 }
  0xa2   : > { %2428 = dma.done.wait (%p3955_p10), %s325_s2, 4096  }
  0xa3   : > { %2430 = vsyncadd (%p3955_p10), %s325_s2, 4294963200 }
  0xa4   : > { %333 = sfence }
  0xa5   : > { %s1695_s21 = sld [smem:[#allocation2 + $0x6]]  ;;  %s1696_s15 = sld [smem:[#allocation2 + $0x7]]  ;;  %v434_v0 = vld [vmem:[%s2862_s17 + $0x80] sm:$0xff]  ;;  %v435_v1 = vld [vmem:[%s2862_s17 + $0x88] sm:$0xff]  ;;  %v436_v5 = vld [vmem:[%s2862_s17 + $0x90] sm:$0xff] }
  0xa6   : > { %v418_v2 = vld [vmem:[%s2862_s17] sm:$0xff]  ;;  %v419_v3 = vld [vmem:[%s2862_s17 + $0x8] sm:$0xff]  ;;  %s1689_s16 = sshll.u32 %s2851_s12, 3  ;;  %v1904_v4 = vpack.c.bf16 %v435_v1, %v434_v0  ;;  %v437_v6 = vld [vmem:[%s2862_s17 + $0x98] sm:$0xff]  ;;  %s3006_s18 = sld [smem:[#allocation2]] }
  0xa7   : > { %v420_v7 = vld [vmem:[%s2862_s17 + $0x10] sm:$0xff]  ;;  %v1906_v8 = vpack.c.bf16 %v419_v3, %v418_v2  ;;  %v421_v9 = vld [vmem:[%s2862_s17 + $0x18] sm:$0xff]  ;;  %v438_v10 = vld [vmem:[%s2862_s17 + $0xa0] sm:$0xff]  ;;  %v1908_v12 = vpack.c.bf16 %v437_v6, %v436_v5  ;;  %s3013_s1 = sld [smem:[#allocation2 + $0x1]]  ;;  %s3025_s20 = sld [smem:[#allocation2 + $0x2]] }
  0xa8   : > { %v439_v11 = vld [vmem:[%s2862_s17 + $0xa8] sm:$0xff]  ;;  %1905 = vmatprep.subr.bf16.mxu0 %v1904_v4  ;;  %v422_v13 = vld [vmem:[%s2862_s17 + $0x20] sm:$0xff]  ;;  %v2882_v15 = vld [vmem:[%s2862_s17 + $0xb0] sm:$0xff]  ;;  %v1910_v16 = vpack.c.bf16 %v421_v9, %v420_v7  ;;  %p372_p9 = scmp.lt.s32.totalorder %s2477_s30, 2  ;;  %s1692_s8 = sld [smem:[#allocation2 + $0x3]] }
  0xa9   : > { %v423_v14 = vld [vmem:[%s2862_s17 + $0x28] sm:$0xff]  ;;  %1907 = vmatpush3.bf16.msra.mxu0 %v1906_v8  ;;  %v441_v17 = vld [vmem:[%s2862_s17 + $0xb8] sm:$0xff]  ;;  %v2886_v18 = vld [vmem:[%s2862_s17 + $0x30] sm:$0xff]  ;;  %v1912_v20 = vpack.c.bf16 %v439_v11, %v438_v10  ;;  %s3956_s24 = sld [smem:[#allocation36_spill]]  ;;  %s361_s0 = sand.u32 1, %s2445_s22  }
  0xaa   : > { %v2889_v19 = vld [vmem:[%s2862_s17 + $0x38] sm:$0xff]  ;;  %1909 = vmatprep.subr.bf16.mxu0 %v1908_v12  ;;  %v1914_v21 = vpack.c.bf16 %v423_v14, %v422_v13  ;;  %v1916_v24 = vpack.c.bf16 %v441_v17, %v2882_v15  ;;  %v2907_v46 = vld [vmem:[%s2855_s11 + $0x8] sm:$0xff]  ;;  %s373_s27 = scalar_select %p372_p9, %s2477_s30, 2 }
  0xab   : > { %v2891_v22 = vstv %s1695_s21  ;;  %v2893_v23 = vstv %s1696_s15  ;;  %v1918_v25 = vpack.c.bf16 %v2889_v19, %v2886_v18  ;;  %521 = vmatprep.mubr.f32.mxu0 %v2907_v46  ;;  %s1694_s13 = sld [smem:[#allocation2 + $0x5]]  ;;  %s1688_s2 = sshll.u32 %s361_s0, 7 }
  0xac   : > { %v846_v26 = vmul.f32 %v2891_v22, %v434_v0  ;;  %v847_v27 = vmul.f32 %v2891_v22, %v435_v1  ;;  %v830_v28 = vmul.f32 %v2891_v22, %v418_v2  ;;  %v831_v29 = vmul.f32 %v2891_v22, %v419_v3  ;;  %s3360_s21 = sld [smem:[#allocation2 + $0x4]]  ;;  %s3362_s15 = sld [smem:[#allocation7 + $0x1]] }
  0xad   : > { %v848_v30 = vmul.f32 %v2891_v22, %v436_v5  ;;  %v849_v31 = vmul.f32 %v2891_v22, %v437_v6  ;;  %v832_v32 = vmul.f32 %v2891_v22, %v420_v7  ;;  %v833_v33 = vmul.f32 %v2891_v22, %v421_v9  ;;  %1911 = vmatpush3.bf16.msra.mxu0 %v1910_v16  ;;  %p1733_p0 = scmp.ne.s32.totalorder %s2477_s30, 0 }
  0xae   : > { %v2016_v34 = vround.rtne.f32 %v846_v26  ;;  %v2017_v35 = vround.rtne.f32 %v847_v27  ;;  %v2000_v36 = vround.rtne.f32 %v830_v28  ;;  %v2001_v37 = vround.rtne.f32 %v831_v29  ;;  %1913 = vmatprep.subr.bf16.mxu0 %v1912_v20  ;;  %v2935_v26 = vld [vmem:[%s2862_s17 + $0xc8] sm:$0xff] }
  0xaf   : > { %v2018_v38 = vround.rtne.f32 %v848_v30  ;;  %v2019_v39 = vround.rtne.f32 %v849_v31  ;;  %v2002_v40 = vround.rtne.f32 %v832_v32  ;;  %v2003_v41 = vround.rtne.f32 %v833_v33  ;;  %v2940_v31 = vld [vmem:[%s2862_s17 + $0x40] sm:$0xff]  ;;  %v2943_v32 = vld [vmem:[%s2862_s17 + $0x48] sm:$0xff]  ;;  %s374_s14 = scalar_lea.vmem %s3956_s24, %s373_s27  ;;  %s3755_s27 = scalar_lea.vmem [#allocation12], %s1689_s16 }
  0xb0   : > { %v1715_v42 = vclamps-f32 %v2016_v34, 127.0  ;;  %v1716_v43 = vclamps-f32 %v2017_v35, 127.0  ;;  %v1699_v44 = vclamps-f32 %v2000_v36, 127.0  ;;  %v1700_v45 = vclamps-f32 %v2001_v37, 127.0  ;;  %v2950_v37 = vld [vmem:[%s2862_s17 + $0xd0] sm:$0xff] }
  0xb1   : > { %v1717_v47 = vclamps-f32 %v2018_v38, 127.0  ;;  %v1718_v48 = vclamps-f32 %v2019_v39, 127.0  ;;  %v1701_v49 = vclamps-f32 %v2002_v40, 127.0  ;;  %v1702_v50 = vclamps-f32 %v2003_v41, 127.0  ;;  %1915 = vmatpush3.bf16.msra.mxu0 %v1914_v21  ;;  %v2930_v21 = vld [vmem:[%s2862_s17 + $0xc0] sm:$0xff]  ;;  %v2953_v38 = vld [vmem:[%s2862_s17 + $0xd8] sm:$0xff] }
  0xb2   : > { %v975_v51 = vmul.f32 %v1715_v42, %v2893_v23  ;;  %v976_v52 = vmul.f32 %v1716_v43, %v2893_v23  ;;  %v959_v53 = vmul.f32 %v1699_v44, %v2893_v23  ;;  %v960_v54 = vmul.f32 %v1700_v45, %v2893_v23  ;;  %1917 = vmatprep.subr.bf16.mxu0 %v1916_v24  ;;  %v2960_v43 = vld [vmem:[%s2862_s17 + $0x50] sm:$0xff] }
  0xb3   : > { %v977_v55 = vmul.f32 %v1717_v47, %v2893_v23  ;;  %v978_v56 = vmul.f32 %v1718_v48, %v2893_v23  ;;  %v961_v57 = vmul.f32 %v1701_v49, %v2893_v23  ;;  %v962_v58 = vmul.f32 %v1702_v50, %v2893_v23  ;;  %v2967_v49 = vld [vmem:[%s2862_s17 + $0x58] sm:$0xff] }
  0xb4   : > { %v1936_v59 = vpack.c.bf16 %v976_v52, %v975_v51  ;;  %v1938_v60 = vpack.c.bf16 %v960_v54, %v959_v53  ;;  %v850_v61 = vmul.f32 %v2891_v22, %v438_v10  ;;  %v851_v62 = vmul.f32 %v2891_v22, %v439_v11 }
  0xb5   : > { %v1940_v63 = vpack.c.bf16 %v978_v56, %v977_v55  ;;  %v1942_v0 = vpack.c.bf16 %v962_v58, %v961_v57  ;;  %v834_v1 = vmul.f32 %v2891_v22, %v422_v13  ;;  %v835_v2 = vmul.f32 %v2891_v22, %v423_v14  ;;  %1919 = vmatpush3.bf16.msra.mxu0 %v1918_v25 }
  0xb6   : > { %1937 = vmatprep.subr.bf16.mxu1 %v1936_v59  ;;  %v2020_v3 = vround.rtne.f32 %v850_v61  ;;  %v2021_v4 = vround.rtne.f32 %v851_v62  ;;  %v852_v5 = vmul.f32 %v2891_v22, %v2882_v15  ;;  %v853_v6 = vmul.f32 %v2891_v22, %v441_v17  ;;  %v2978_v62 = vld [vmem:[%s2862_s17 + $0xe0] sm:$0xff] }
  0xb7   : > { %1939 = vmatpush3.bf16.msra.mxu1 %v1938_v60  ;;  %v2004_v7 = vround.rtne.f32 %v834_v1  ;;  %v2005_v8 = vround.rtne.f32 %v835_v2  ;;  %v836_v9 = vmul.f32 %v2891_v22, %v2886_v18  ;;  %v837_v10 = vmul.f32 %v2891_v22, %v2889_v19 }
  0xb8   : > { %1941 = vmatprep.subr.bf16.mxu1 %v1940_v63  ;;  %v1719_v11 = vclamps-f32 %v2020_v3, 127.0  ;;  %v1720_v12 = vclamps-f32 %v2021_v4, 127.0  ;;  %v2022_v13 = vround.rtne.f32 %v852_v5  ;;  %v2023_v14 = vround.rtne.f32 %v853_v6 }
  0xb9   : > { %v1703_v15 = vclamps-f32 %v2004_v7, 127.0  ;;  %v1704_v16 = vclamps-f32 %v2005_v8, 127.0  ;;  %v2006_v17 = vround.rtne.f32 %v836_v9  ;;  %v2007_v20 = vround.rtne.f32 %v837_v10  ;;  %v2983_v7 = vld [vmem:[%s2862_s17 + $0xe8] sm:$0xff] }
  0xba   : > { %v979_v24 = vmul.f32 %v1719_v11, %v2893_v23  ;;  %v980_v18 = vmul.f32 %v1720_v12, %v2893_v23  ;;  %v1721_v19 = vclamps-f32 %v2022_v13, 127.0  ;;  %v1722_v25 = vclamps-f32 %v2023_v14, 127.0  ;;  %v2990_v12 = vld [vmem:[%s2862_s17 + $0x60] sm:$0xff]  ;;  %v2993_v13 = vld [vmem:[%s2862_s17 + $0x68] sm:$0xff] }
  0xbb   : > { %1943 = vmatpush3.bf16.msra.mxu1 %v1942_v0  ;;  %v963_v27 = vmul.f32 %v1703_v15, %v2893_v23  ;;  %v964_v28 = vmul.f32 %v1704_v16, %v2893_v23  ;;  %v1705_v29 = vclamps-f32 %v2006_v17, 127.0  ;;  %v1706_v30 = vclamps-f32 %v2007_v20, 127.0  ;;  %v2998_v20 = vld [vmem:[%s2862_s17 + $0xf0] sm:$0xff] }
  0xbc   : > { %v1944_v33 = vpack.c.bf16 %v980_v18, %v979_v24  ;;  %v981_v34 = vmul.f32 %v1721_v19, %v2893_v23  ;;  %v982_v35 = vmul.f32 %v1722_v25, %v2893_v23  ;;  %v854_v36 = vmul.f32 %v2891_v22, %v2930_v21  ;;  %v3001_v24 = vld [vmem:[%s2862_s17 + $0xf8] sm:$0xff] }
  0xbd   : > { %v1946_v39 = vpack.c.bf16 %v964_v28, %v963_v27  ;;  %v965_v40 = vmul.f32 %v1705_v29, %v2893_v23  ;;  %v966_v41 = vmul.f32 %v1706_v30, %v2893_v23  ;;  %v855_v42 = vmul.f32 %v2891_v22, %v2935_v26 }
  0xbe   : > { %1945 = vmatprep.subr.bf16.mxu1 %v1944_v33  ;;  %v1948_v44 = vpack.c.bf16 %v982_v35, %v981_v34  ;;  %v2024_v45 = vround.rtne.f32 %v854_v36  ;;  %v838_v47 = vmul.f32 %v2891_v22, %v2940_v31  ;;  %v839_v48 = vmul.f32 %v2891_v22, %v2943_v32 }
  0xbf   : > { %1947 = vmatpush3.bf16.msra.mxu1 %v1946_v39  ;;  %v1950_v50 = vpack.c.bf16 %v966_v41, %v965_v40  ;;  %v2025_v51 = vround.rtne.f32 %v855_v42  ;;  %v856_v52 = vmul.f32 %v2891_v22, %v2950_v37  ;;  %v857_v53 = vmul.f32 %v2891_v22, %v2953_v38  ;;  %v3020_v40 = vld [vmem:[%s2862_s17 + $0x70] sm:$0xff]  ;;  %v3023_v41 = vld [vmem:[%s2862_s17 + $0x78] sm:$0xff]  ;;  %s3358_s17 = sld [smem:[#allocation7]] }
  0xc0   : > { %1949 = vmatprep.subr.bf16.mxu1 %v1948_v44  ;;  %v1723_v54 = vclamps-f32 %v2024_v45, 127.0  ;;  %v2008_v55 = vround.rtne.f32 %v838_v47  ;;  %v2009_v56 = vround.rtne.f32 %v839_v48  ;;  %v840_v57 = vmul.f32 %v2891_v22, %v2960_v43 }
  0xc1   : > { %v1724_v58 = vclamps-f32 %v2025_v51, 127.0  ;;  %v2026_v59 = vround.rtne.f32 %v856_v52  ;;  %v2027_v60 = vround.rtne.f32 %v857_v53  ;;  %v841_v61 = vmul.f32 %v2891_v22, %v2967_v49 }
  0xc2   : > { %v983_v63 = vmul.f32 %v1723_v54, %v2893_v23  ;;  %v1707_v0 = vclamps-f32 %v2008_v55, 127.0  ;;  %v1708_v1 = vclamps-f32 %v2009_v56, 127.0  ;;  %v2010_v2 = vround.rtne.f32 %v840_v57 }
  0xc3   : > { %1951 = vmatpush3.bf16.msra.mxu1 %v1950_v50  ;;  %v984_v3 = vmul.f32 %v1724_v58, %v2893_v23  ;;  %v1725_v4 = vclamps-f32 %v2026_v59, 127.0  ;;  %v1726_v5 = vclamps-f32 %v2027_v60, 127.0  ;;  %v2011_v6 = vround.rtne.f32 %v841_v61 }
  0xc4   : > { %v967_v8 = vmul.f32 %v1707_v0, %v2893_v23  ;;  %v968_v9 = vmul.f32 %v1708_v1, %v2893_v23  ;;  %v1709_v10 = vclamps-f32 %v2010_v2, 127.0  ;;  %v858_v11 = vmul.f32 %v2891_v22, %v2978_v62  ;;  %v3040_v0 = vld [vmem:[%s2855_s11] sm:$0xff] }
  0xc5   : > { %v1952_v14 = vpack.c.bf16 %v984_v3, %v983_v63  ;;  %v985_v15 = vmul.f32 %v1725_v4, %v2893_v23  ;;  %v986_v16 = vmul.f32 %v1726_v5, %v2893_v23  ;;  %v1710_v17 = vclamps-f32 %v2011_v6, 127.0  ;;  %v3050_v6 = vld [vmem:[%s2855_s11 + $0x18] sm:$0xff] }
  0xc6   : > { %v1954_v18 = vpack.c.bf16 %v968_v9, %v967_v8  ;;  %v969_v19 = vmul.f32 %v1709_v10, %v2893_v23  ;;  %v859_v25 = vmul.f32 %v2891_v22, %v2983_v7  ;;  %v2028_v27 = vround.rtne.f32 %v858_v11  ;;  %v3053_v8 = vld [vmem:[%s2855_s11 + $0x10] sm:$0xff] }
  0xc7   : > { %1953 = vmatprep.subr.bf16.mxu1 %v1952_v14  ;;  %v1956_v28 = vpack.c.bf16 %v986_v16, %v985_v15  ;;  %v970_v29 = vmul.f32 %v1710_v17, %v2893_v23  ;;  %v842_v30 = vmul.f32 %v2891_v22, %v2990_v12  ;;  %v843_v33 = vmul.f32 %v2891_v22, %v2993_v13 }
  0xc8   : > { %1955 = vmatpush3.bf16.msra.mxu1 %v1954_v18  ;;  %v2029_v34 = vround.rtne.f32 %v859_v25  ;;  %v1727_v35 = vclamps-f32 %v2028_v27, 127.0  ;;  %v860_v36 = vmul.f32 %v2891_v22, %v2998_v20  ;;  %v861_v39 = vmul.f32 %v2891_v22, %v3001_v24  ;;  %v3068_v18 = vld [vmem:[%s2855_s11 + $0x28] sm:$0xff] }
  0xc9   : > { %1957 = vmatprep.subr.bf16.mxu1 %v1956_v28  ;;  %v1958_v42 = vpack.c.bf16 %v970_v29, %v969_v19  ;;  %v2012_v44 = vround.rtne.f32 %v842_v30  ;;  %v2013_v45 = vround.rtne.f32 %v843_v33  ;;  %v1920_v47 = vpack.c.bf16 %v2935_v26, %v2930_v21 }
  0xca   : > { %v1728_v48 = vclamps-f32 %v2029_v34, 127.0  ;;  %v987_v50 = vmul.f32 %v1727_v35, %v2893_v23  ;;  %v2030_v51 = vround.rtne.f32 %v860_v36  ;;  %v2031_v52 = vround.rtne.f32 %v861_v39  ;;  %v3088_v35 = vld [vmem:[%s2855_s11 + $0x38] sm:$0xff]  ;;  %v3091_v36 = vld [vmem:[%s2855_s11 + $0x30] sm:$0xff] }
  0xcb   : > { %v1711_v53 = vclamps-f32 %v2012_v44, 127.0  ;;  %v1712_v54 = vclamps-f32 %v2013_v45, 127.0  ;;  %1921 = vmatprep.subr.bf16.mxu0 %v1920_v47  ;;  %v844_v55 = vmul.f32 %v2891_v22, %v3020_v40  ;;  %v845_v56 = vmul.f32 %v2891_v22, %v3023_v41 }
  0xcc   : > { %1959 = vmatpush3.bf16.msra.mxu1 %v1958_v42  ;;  %v988_v57 = vmul.f32 %v1728_v48, %v2893_v23  ;;  %v1729_v21 = vclamps-f32 %v2030_v51, 127.0  ;;  %v1730_v26 = vclamps-f32 %v2031_v52, 127.0  ;;  %v1922_v58 = vpack.c.bf16 %v2943_v32, %v2940_v31 }
  0xcd   : > { %v971_v59 = vmul.f32 %v1711_v53, %v2893_v23  ;;  %v972_v60 = vmul.f32 %v1712_v54, %v2893_v23  ;;  %v2014_v61 = vround.rtne.f32 %v844_v55  ;;  %v2015_v63 = vround.rtne.f32 %v845_v56 }
  0xce   : > { %v1960_v22 = vpack.c.bf16 %v988_v57, %v987_v50  ;;  %v989_v1 = vmul.f32 %v1729_v21, %v2893_v23  ;;  %v990_v2 = vmul.f32 %v1730_v26, %v2893_v23  ;;  %1923 = vmatpush3.bf16.msra.mxu0 %v1922_v58  ;;  %v3045_v3 = vstv %s3006_s18  ;;  %v3110_v58 = vld [vmem:[%s2855_s11 + $0x48] sm:$0xff] }
  0xcf   : > { %v1962_v31 = vpack.c.bf16 %v972_v60, %v971_v59  ;;  %v1713_v32 = vclamps-f32 %v2014_v61, 127.0  ;;  %v1714_v4 = vclamps-f32 %v2015_v63, 127.0  ;;  %v604_v5 = vmul.f32 %v3045_v3, %v2907_v46 }
  0xd0   : > { %1961 = vmatprep.subr.bf16.mxu1 %v1960_v22  ;;  %v1964_v9 = vpack.c.bf16 %v990_v2, %v989_v1  ;;  %v3056_v10 = vstv %s3025_s20  ;;  %v3059_v11 = vstv %s3013_s1  ;;  %v603_v14 = vmul.f32 %v3045_v3, %v3040_v0  ;;  %v3116_v22 = vld [vmem:[%s2855_s11 + $0x40] sm:$0xff]  ;;  %s1732_s1 = sshll.u32 %s2477_s30, 7  ;;  %s3381_s20 = scalar_lea.vmem [#allocation11], %s1688_s2 }
  0xd1   : > { %1963 = vmatpush3.bf16.msra.mxu1 %v1962_v31  ;;  %v973_v15 = vmul.f32 %v1713_v32, %v2893_v23  ;;  %v974_v16 = vmul.f32 %v1714_v4, %v2893_v23  ;;  %v1969_v46 = vround.rtne.f32 %v604_v5  ;;  %v1924_v17 = vpack.c.bf16 %v2953_v38, %v2950_v37  ;;  %v3077_v23 = vld [vmem:[%s2855_s11 + $0x20] sm:$0xff] }
  0xd2   : > { %1965 = vmatprep.subr.bf16.mxu1 %v1964_v9  ;;  %v1968_v19 = vround.rtne.f32 %v603_v14  ;;  %v1926_v25 = vpack.c.bf16 %v2967_v49, %v2960_v43  ;;  %v606_v27 = vmul.f32 %v3045_v3, %v3050_v6  ;;  %v605_v28 = vmul.f32 %v3045_v3, %v3053_v8 }
  0xd3   : > { %v1966_v29 = vpack.c.bf16 %v974_v16, %v973_v15  ;;  %v669_v37 = vadd.f32 %v1969_v46, %v3056_v10  ;;  %1925 = vmatprep.subr.bf16.mxu0 %v1924_v17  ;;  %v1928_v38 = vpack.c.bf16 %v2983_v7, %v2978_v62  ;;  %v1930_v30 = vpack.c.bf16 %v2993_v13, %v2990_v12  ;;  %v3124_v15 = vld [vmem:[%s2855_s11 + $0x58] sm:$0xff]  ;;  %v3127_v16 = vld [vmem:[%s2855_s11 + $0x50] sm:$0xff] }
  0xd4   : > { %v668_v43 = vadd.f32 %v1968_v19, %v3056_v10  ;;  %1927 = vmatpush3.bf16.msra.mxu0 %v1926_v25  ;;  %v1971_v49 = vround.rtne.f32 %v606_v27  ;;  %v1970_v33 = vround.rtne.f32 %v605_v28  ;;  %v608_v34 = vmul.f32 %v3045_v3, %v3068_v18 }
  0xd5   : > { %1967 = vmatpush3.bf16.msra.mxu1 %v1966_v29  ;;  %v701_v39 = vmax.f32 %v669_v37, 0.0  ;;  %1929 = vmatprep.subr.bf16.mxu0 %v1928_v38  ;;  %v607_v62 = vmul.f32 %v3045_v3, %v3077_v23  ;;  %v1932_v7 = vpack.c.bf16 %v3001_v24, %v2998_v20  ;;  %v1934_v12 = vpack.c.bf16 %v3023_v41, %v3020_v40  ;;  %v3137_v38 = vld [vmem:[%s2855_s11 + $0x68] sm:$0xff] }
  0xd6   : > { %v700_v13 = vmax.f32 %v668_v43, 0.0  ;;  %v671_v42 = vadd.f32 %v1971_v49, %v3056_v10  ;;  %v670_v44 = vadd.f32 %v1970_v33, %v3056_v10  ;;  %v1973_v45 = vround.rtne.f32 %v608_v34  ;;  %v3146_v34 = vld [vmem:[%s2855_s11 + $0x60] sm:$0xff] }
  0xd7   : > { %v733_v47 = vmin.f32 %v701_v39, 255.0  ;;  %v1972_v48 = vround.rtne.f32 %v607_v62  ;;  %v610_v50 = vmul.f32 %v3045_v3, %v3088_v35  ;;  %v609_v51 = vmul.f32 %v3045_v3, %v3091_v36 }
  0xd8   : > { %v732_v52 = vmin.f32 %v700_v13, 255.0  ;;  %v703_v20 = vmax.f32 %v671_v42, 0.0  ;;  %v702_v24 = vmax.f32 %v670_v44, 0.0  ;;  %1931 = vmatpush3.bf16.msra.mxu0 %v1930_v30  ;;  %v673_v40 = vadd.f32 %v1973_v45, %v3056_v10  ;;  %v3156_v44 = vld [vmem:[%s2855_s11 + $0x78] sm:$0xff]  ;;  %v3159_v45 = vld [vmem:[%s2855_s11 + $0x70] sm:$0xff] }
  0xd9   : > { %v765_v41 = vsub.f32 %v733_v47, %v3056_v10  ;;  %v672_v53 = vadd.f32 %v1972_v48, %v3056_v10  ;;  %1933 = vmatprep.subr.bf16.mxu0 %v1932_v7  ;;  %v1975_v54 = vround.rtne.f32 %v610_v50  ;;  %v1974_v55 = vround.rtne.f32 %v609_v51 }
  0xda   : > { %v764_v56 = vsub.f32 %v732_v52, %v3056_v10  ;;  %v735_v57 = vmin.f32 %v703_v20, 255.0  ;;  %v734_v21 = vmin.f32 %v702_v24, 255.0  ;;  %v705_v26 = vmax.f32 %v673_v40, 0.0 }
  0xdb   : > { %v798_v59 = vmul.f32 %v3059_v11, %v765_v41  ;;  %v704_v60 = vmax.f32 %v672_v53, 0.0  ;;  %v675_v61 = vadd.f32 %v1975_v54, %v3056_v10  ;;  %v674_v63 = vadd.f32 %v1974_v55, %v3056_v10 }
  0xdc   : > { %v797_v1 = vmul.f32 %v3059_v11, %v764_v56  ;;  %v767_v2 = vsub.f32 %v735_v57, %v3056_v10  ;;  %v766_v31 = vsub.f32 %v734_v21, %v3056_v10  ;;  %v737_v32 = vmin.f32 %v705_v26, 255.0  ;;  %1935 = vmatpush3.bf16.msra.mxu0 %v1934_v12 }
  0xdd   : > { %1055 = vmatprep.mubr.f32.mxu1 %v798_v59  ;;  %v736_v4 = vmin.f32 %v704_v60, 255.0  ;;  %v707_v5 = vmax.f32 %v675_v61, 0.0  ;;  %v706_v9 = vmax.f32 %v674_v63, 0.0  ;;  %v612_v14 = vmul.f32 %v3045_v3, %v3110_v58 }
  0xde   : > { %1056 = vmatmul.mubr.f32.vlgmr.msra.gmra.mrb[0].mxu1 %v797_v1  ;;  %v800_v46 = vmul.f32 %v3059_v11, %v767_v2  ;;  %v799_v17 = vmul.f32 %v3059_v11, %v766_v31  ;;  %v769_v19 = vsub.f32 %v737_v32, %v3056_v10  ;;  %v611_v25 = vmul.f32 %v3045_v3, %v3116_v22  ;;  %v3180_v31 = vld [vmem:[%s2855_s11 + $0x88] sm:$0xff] }
  0xdf   : > { %v768_v27 = vsub.f32 %v736_v4, %v3056_v10  ;;  %v739_v28 = vmin.f32 %v707_v5, 255.0  ;;  %v738_v29 = vmin.f32 %v706_v9, 255.0  ;;  %522 = vmatmul.mubr.f32.vlgmr.msra.gmra.mrb[0].mxu0 %v3040_v0  ;;  %v1977_v37 = vround.rtne.f32 %v612_v14  ;;  %v3186_v9 = vld [vmem:[%s2855_s11 + $0x80] sm:$0xff] }
  0xe0   : > { %1060 = vmatprep.mubr.f32.mxu1 %v800_v46  ;;  %v802_v30 = vmul.f32 %v3059_v11, %v769_v19  ;;  %526 = vmatprep.mubr.f32.mxu0 %v3050_v6  ;;  %v1976_v43 = vround.rtne.f32 %v611_v25  ;;  %v614_v49 = vmul.f32 %v3045_v3, %v3124_v15  ;;  %v613_v33 = vmul.f32 %v3045_v3, %v3127_v16 }
  0xe1   : > { %v801_v0 = vmul.f32 %v3059_v11, %v768_v27  ;;  %v771_v39 = vsub.f32 %v739_v28, %v3056_v10  ;;  %v770_v62 = vsub.f32 %v738_v29, %v3056_v10  ;;  %v677_v7 = vadd.f32 %v1977_v37, %v3056_v10  ;;  %v3195_v29 = vld [vmem:[%s2855_s11 + $0x98] sm:$0xff]  ;;  %v3198_v37 = vld [vmem:[%s2855_s11 + $0x90] sm:$0xff] }
  0xe2   : > { %1061 = vmatmul.mubr.f32.gmra.mrb[2].mxu1 %v799_v17  ;;  %v676_v6 = vadd.f32 %v1976_v43, %v3056_v10  ;;  %v1979_v12 = vround.rtne.f32 %v614_v49  ;;  %v1978_v13 = vround.rtne.f32 %v613_v33  ;;  %v616_v42 = vmul.f32 %v3045_v3, %v3137_v38 }
  0xe3   : > { %1065 = vmatprep.mubr.f32.mxu1 %v802_v30  ;;  %v804_v47 = vmul.f32 %v3059_v11, %v771_v39  ;;  %v803_v48 = vmul.f32 %v3059_v11, %v770_v62  ;;  %v709_v50 = vmax.f32 %v677_v7, 0.0  ;;  %527 = vmatmul.mubr.f32.gmra.mrb[2].mxu0 %v3053_v8  ;;  %v615_v51 = vmul.f32 %v3045_v3, %v3146_v34 }
  0xe4   : > { %v708_v52 = vmax.f32 %v676_v6, 0.0  ;;  %v679_v20 = vadd.f32 %v1979_v12, %v3056_v10  ;;  %531 = vmatprep.mubr.f32.mxu0 %v3068_v18  ;;  %v678_v24 = vadd.f32 %v1978_v13, %v3056_v10  ;;  %v1981_v40 = vround.rtne.f32 %v616_v42  ;;  %v3213_v13 = vld [vmem:[%s2855_s11 + $0xa8] sm:$0xff]  ;;  %v3216_v42 = vld [vmem:[%s2855_s11 + $0xa0] sm:$0xff] }
  0xe5   : > { %v741_v41 = vmin.f32 %v709_v50, 255.0  ;;  %v1980_v53 = vround.rtne.f32 %v615_v51  ;;  %v618_v54 = vmul.f32 %v3045_v3, %v3156_v44  ;;  %v617_v55 = vmul.f32 %v3045_v3, %v3159_v45 }
  0xe6   : > { %1066 = vmatmul.mubr.f32.gmra.mrb[4].mxu1 %v801_v0  ;;  %v740_v8 = vmin.f32 %v708_v52, 255.0  ;;  %v711_v56 = vmax.f32 %v679_v20, 0.0  ;;  %v710_v57 = vmax.f32 %v678_v24, 0.0  ;;  %v681_v21 = vadd.f32 %v1981_v40, %v3056_v10  ;;  %v3226_v40 = vld [vmem:[%s2855_s11 + $0xb8] sm:$0xff] }
  0xe7   : > { %1070 = vmatprep.mubr.f32.mxu1 %v804_v47  ;;  %v773_v18 = vsub.f32 %v741_v41, %v3056_v10  ;;  %532 = vmatmul.mubr.f32.gmra.mrb[4].mxu0 %v3077_v23  ;;  %v680_v26 = vadd.f32 %v1980_v53, %v3056_v10  ;;  %v1983_v59 = vround.rtne.f32 %v618_v54  ;;  %v1982_v60 = vround.rtne.f32 %v617_v55  ;;  %v3229_v41 = vld [vmem:[%s2855_s11 + $0xb0] sm:$0xff] }
  0xe8   : > { %v772_v61 = vsub.f32 %v740_v8, %v3056_v10  ;;  %v743_v63 = vmin.f32 %v711_v56, 255.0  ;;  %v742_v1 = vmin.f32 %v710_v57, 255.0  ;;  %v713_v2 = vmax.f32 %v681_v21, 0.0  ;;  %536 = vmatprep.mubr.f32.mxu0 %v3088_v35 }
  0xe9   : > { %v806_v32 = vmul.f32 %v3059_v11, %v773_v18  ;;  %v712_v4 = vmax.f32 %v680_v26, 0.0  ;;  %v683_v23 = vadd.f32 %v1983_v59, %v3056_v10  ;;  %v682_v5 = vadd.f32 %v1982_v60, %v3056_v10 }
  0xea   : > { %1071 = vmatmul.mubr.f32.gmra.mrb[6].mxu1 %v803_v48  ;;  %v805_v14 = vmul.f32 %v3059_v11, %v772_v61  ;;  %v775_v46 = vsub.f32 %v743_v63, %v3056_v10  ;;  %v774_v35 = vsub.f32 %v742_v1, %v3056_v10  ;;  %v745_v17 = vmin.f32 %v713_v2, 255.0 }
  0xeb   : > { %1075 = vmatprep.mubr.f32.mxu1 %v806_v32  ;;  %v744_v19 = vmin.f32 %v712_v4, 255.0  ;;  %537 = vmatmul.mubr.f32.gmra.mrb[6].mxu0 %v3091_v36  ;;  %v715_v25 = vmax.f32 %v683_v23, 0.0  ;;  %v714_v27 = vmax.f32 %v682_v5, 0.0  ;;  %v620_v28 = vmul.f32 %v3045_v3, %v3180_v31 }
  0xec   : > { %v808_v30 = vmul.f32 %v3059_v11, %v775_v46  ;;  %v807_v43 = vmul.f32 %v3059_v11, %v774_v35  ;;  %v777_v49 = vsub.f32 %v745_v17, %v3056_v10  ;;  %541 = vmatprep.mubr.f32.mxu0 %v3110_v58  ;;  %v619_v36 = vmul.f32 %v3045_v3, %v3186_v9 }
  0xed   : > { %v776_v33 = vsub.f32 %v744_v19, %v3056_v10  ;;  %v747_v0 = vmin.f32 %v715_v25, 255.0  ;;  %v746_v39 = vmin.f32 %v714_v27, 255.0  ;;  %v1985_v62 = vround.rtne.f32 %v620_v28  ;;  %v3253_v25 = vld [vmem:[%s2855_s11 + $0xc8] sm:$0xff]  ;;  %v3256_v27 = vld [vmem:[%s2855_s11 + $0xc0] sm:$0xff] }
  0xee   : > { %1076 = vmatmul.mubr.f32.gmra.mrb[8].mxu1 %v805_v14  ;;  %v810_v7 = vmul.f32 %v3059_v11, %v777_v49  ;;  %v1984_v6 = vround.rtne.f32 %v619_v36  ;;  %v622_v12 = vmul.f32 %v3045_v3, %v3195_v29  ;;  %v621_v58 = vmul.f32 %v3045_v3, %v3198_v37 }
  0xef   : > { %1080 = vmatprep.mubr.f32.mxu1 %v808_v30  ;;  %v809_v47 = vmul.f32 %v3059_v11, %v776_v33  ;;  %v779_v48 = vsub.f32 %v747_v0, %v3056_v10  ;;  %v778_v50 = vsub.f32 %v746_v39, %v3056_v10  ;;  %542 = vmatmul.mubr.f32.gmra.mrb[8].mxu0 %v3116_v22  ;;  %v3263_v0 = vld [vmem:[%s2855_s11 + $0xd8] sm:$0xff]  ;;  %v3266_v39 = vld [vmem:[%s2855_s11 + $0xd0] sm:$0xff] }
  0xf0   : > { %v685_v51 = vadd.f32 %v1985_v62, %v3056_v10  ;;  %546 = vmatprep.mubr.f32.mxu0 %v3124_v15  ;;  %v684_v52 = vadd.f32 %v1984_v6, %v3056_v10  ;;  %v1987_v20 = vround.rtne.f32 %v622_v12  ;;  %v1986_v24 = vround.rtne.f32 %v621_v58 }
  0xf1   : > { %v812_v53 = vmul.f32 %v3059_v11, %v779_v48  ;;  %v811_v54 = vmul.f32 %v3059_v11, %v778_v50  ;;  %v624_v55 = vmul.f32 %v3045_v3, %v3213_v13  ;;  %v623_v22 = vmul.f32 %v3045_v3, %v3216_v42 }
  0xf2   : > { %1081 = vmatmul.mubr.f32.gmra.mrb[10].mxu1 %v807_v43  ;;  %v717_v15 = vmax.f32 %v685_v51, 0.0  ;;  %v716_v8 = vmax.f32 %v684_v52, 0.0  ;;  %v687_v56 = vadd.f32 %v1987_v20, %v3056_v10  ;;  %v686_v57 = vadd.f32 %v1986_v24, %v3056_v10  ;;  %v3283_v24 = vld [vmem:[%s2855_s11 + $0xe8] sm:$0xff] }
  0xf3   : > { %1085 = vmatprep.mubr.f32.mxu1 %v810_v7  ;;  %547 = vmatmul.mubr.f32.gmra.mrb[10].mxu0 %v3127_v16  ;;  %v1989_v21 = vround.rtne.f32 %v624_v55  ;;  %v1988_v18 = vround.rtne.f32 %v623_v22  ;;  %v626_v26 = vmul.f32 %v3045_v3, %v3226_v40  ;;  %v625_v59 = vmul.f32 %v3045_v3, %v3229_v41 }
  0xf4   : > { %v749_v60 = vmin.f32 %v717_v15, 255.0  ;;  %v748_v61 = vmin.f32 %v716_v8, 255.0  ;;  %v719_v63 = vmax.f32 %v687_v56, 0.0  ;;  %551 = vmatprep.mubr.f32.mxu0 %v3137_v38  ;;  %v718_v1 = vmax.f32 %v686_v57, 0.0  ;;  %v3292_v56 = vld [vmem:[%s2855_s11 + $0xe0] sm:$0xff]  ;;  %v3295_v57 = vld [vmem:[%s2855_s11 + $0xf8] sm:$0xff] }
  0xf5   : > { %v689_v2 = vadd.f32 %v1989_v21, %v3056_v10  ;;  %v688_v16 = vadd.f32 %v1988_v18, %v3056_v10  ;;  %v1991_v32 = vround.rtne.f32 %v626_v26  ;;  %v1990_v4 = vround.rtne.f32 %v625_v59  ;;  %v3298_v21 = vld [vmem:[%s2855_s11 + $0xf0] sm:$0xff]  ;;  %s3957_s11 = sld [smem:[#allocation22_spill]] }
  0xf6   : > { %1086 = vmatmul.mubr.f32.gmra.mrb[12].mxu1 %v809_v47  ;;  %v781_v23 = vsub.f32 %v749_v60, %v3056_v10  ;;  %v780_v5 = vsub.f32 %v748_v61, %v3056_v10  ;;  %v751_v14 = vmin.f32 %v719_v63, 255.0  ;;  %v750_v46 = vmin.f32 %v718_v1, 255.0 }
  0xf7   : > { %1090 = vmatprep.mubr.f32.mxu1 %v812_v53  ;;  %552 = vmatmul.mubr.f32.gmra.mrb[12].mxu0 %v3146_v34  ;;  %v721_v38 = vmax.f32 %v689_v2, 0.0  ;;  %v720_v35 = vmax.f32 %v688_v16, 0.0  ;;  %v691_v17 = vadd.f32 %v1991_v32, %v3056_v10  ;;  %v690_v19 = vadd.f32 %v1990_v4, %v3056_v10 }
  0xf8   : > { %v814_v28 = vmul.f32 %v3059_v11, %v781_v23  ;;  %v783_v30 = vsub.f32 %v751_v14, %v3056_v10  ;;  %v782_v43 = vsub.f32 %v750_v46, %v3056_v10  ;;  %556 = vmatprep.mubr.f32.mxu0 %v3156_v44  ;;  %v813_v62 = vmul.f32 %v3059_v11, %v780_v5 }
  0xf9   : > { %v753_v34 = vmin.f32 %v721_v38, 255.0  ;;  %v752_v49 = vmin.f32 %v720_v35, 255.0  ;;  %v723_v36 = vmax.f32 %v691_v17, 0.0  ;;  %v722_v33 = vmax.f32 %v690_v19, 0.0 }
  0xfa   : > { %1091 = vmatmul.mubr.f32.gmra.mrb[14].mxu1 %v811_v54  ;;  %v816_v7 = vmul.f32 %v3059_v11, %v783_v30  ;;  %v628_v6 = vmul.f32 %v3045_v3, %v3253_v25  ;;  %v627_v44 = vmul.f32 %v3045_v3, %v3256_v27  ;;  %v630_v52 = vmul.f32 %v3045_v3, %v3263_v0 }
  0xfb   : > { %1095 = vmatprep.mubr.f32.mxu1 %v814_v28  ;;  %v785_v12 = vsub.f32 %v753_v34, %v3056_v10  ;;  %v784_v58 = vsub.f32 %v752_v49, %v3056_v10  ;;  %557 = vmatmul.mubr.f32.gmra.mrb[14].mxu0 %v3159_v45  ;;  %v755_v47 = vmin.f32 %v723_v36, 255.0  ;;  %v754_v48 = vmin.f32 %v722_v33, 255.0  ;;  %s1731_s18 = sshll.u32 %s3957_s11, 7 }
  0xfc   : > { %561 = vmatprep.mubr.f32.mxu0 %v3180_v31  ;;  %v1993_v50 = vround.rtne.f32 %v628_v6  ;;  %v1992_v51 = vround.rtne.f32 %v627_v44  ;;  %v629_v20 = vmul.f32 %v3045_v3, %v3266_v39  ;;  %v815_v53 = vmul.f32 %v3059_v11, %v782_v43 }
  0xfd   : > { %v818_v45 = vmul.f32 %v3059_v11, %v785_v12  ;;  %v817_v54 = vmul.f32 %v3059_v11, %v784_v58  ;;  %v787_v31 = vsub.f32 %v755_v47, %v3056_v10  ;;  %v1995_v15 = vround.rtne.f32 %v630_v52 }
  0xfe   : > { %1096 = vmatmul.mubr.f32.gmra.mrb[16].mxu1 %v813_v62  ;;  %v693_v55 = vadd.f32 %v1993_v50, %v3056_v10  ;;  %v692_v22 = vadd.f32 %v1992_v51, %v3056_v10  ;;  %v1994_v8 = vround.rtne.f32 %v629_v20  ;;  %v786_v26 = vsub.f32 %v754_v48, %v3056_v10 }
  0xff   : > { %1100 = vmatprep.mubr.f32.mxu1 %v816_v7  ;;  %v820_v18 = vmul.f32 %v3059_v11, %v787_v31  ;;  %562 = vmatmul.mubr.f32.gmra.mrb[16].mxu0 %v3186_v9  ;;  %v632_v59 = vmul.f32 %v3045_v3, %v3283_v24  ;;  %v695_v63 = vadd.f32 %v1995_v15, %v3056_v10  ;;  %v3364_v31 = vstv %s1692_s8 }
 0x100   : > { %v725_v60 = vmax.f32 %v693_v55, 0.0  ;;  %566 = vmatprep.mubr.f32.mxu0 %v3195_v29  ;;  %v724_v61 = vmax.f32 %v692_v22, 0.0  ;;  %v694_v1 = vadd.f32 %v1994_v8, %v3056_v10  ;;  %v631_v16 = vmul.f32 %v3045_v3, %v3292_v56 }
 0x101   : > { %v1997_v2 = vround.rtne.f32 %v632_v59  ;;  %v634_v32 = vmul.f32 %v3045_v3, %v3295_v57  ;;  %v633_v9 = vmul.f32 %v3045_v3, %v3298_v21  ;;  %v727_v5 = vmax.f32 %v695_v63, 0.0 }
 0x102   : > { %1101 = vmatmul.mubr.f32.gmra.mrb[18].mxu1 %v815_v53  ;;  %v757_v4 = vmin.f32 %v725_v60, 255.0  ;;  %v756_v23 = vmin.f32 %v724_v61, 255.0  ;;  %v726_v29 = vmax.f32 %v694_v1, 0.0  ;;  %v1996_v46 = vround.rtne.f32 %v631_v16 }
 0x103   : > { %1105 = vmatprep.mubr.f32.mxu1 %v818_v45  ;;  %567 = vmatmul.mubr.f32.gmra.mrb[18].mxu0 %v3198_v37  ;;  %v697_v14 = vadd.f32 %v1997_v2, %v3056_v10  ;;  %v1999_v38 = vround.rtne.f32 %v634_v32  ;;  %v1998_v35 = vround.rtne.f32 %v633_v9  ;;  %v759_v19 = vmin.f32 %v727_v5, 255.0 }
 0x104   : > { %v789_v17 = vsub.f32 %v757_v4, %v3056_v10  ;;  %571 = vmatprep.mubr.f32.mxu0 %v3213_v13  ;;  %v819_v3 = vmul.f32 %v3059_v11, %v786_v26  ;;  %v696_v30 = vadd.f32 %v1996_v46, %v3056_v10  ;;  %v788_v34 = vsub.f32 %v756_v23, %v3056_v10 }
 0x105   : > { %v729_v28 = vmax.f32 %v697_v14, 0.0  ;;  %v699_v43 = vadd.f32 %v1999_v38, %v3056_v10  ;;  %v758_v49 = vmin.f32 %v726_v29, 255.0  ;;  %v698_v36 = vadd.f32 %v1998_v35, %v3056_v10 }
 0x106   : > { %1106 = vmatmul.mubr.f32.gmra.mrb[20].mxu1 %v817_v54  ;;  %v822_v37 = vmul.f32 %v3059_v11, %v789_v17  ;;  %v791_v33 = vsub.f32 %v759_v19, %v3056_v10  ;;  %v728_v62 = vmax.f32 %v696_v30, 0.0  ;;  %v821_v6 = vmul.f32 %v3059_v11, %v788_v34 }
 0x107   : > { %1110 = vmatprep.mubr.f32.mxu1 %v820_v18  ;;  %572 = vmatmul.mubr.f32.gmra.mrb[20].mxu0 %v3216_v42  ;;  %v761_v13 = vmin.f32 %v729_v28, 255.0  ;;  %v731_v7 = vmax.f32 %v699_v43, 0.0  ;;  %v790_v44 = vsub.f32 %v758_v49, %v3056_v10  ;;  %v730_v58 = vmax.f32 %v698_v36, 0.0 }
 0x108   : > { %576 = vmatprep.mubr.f32.mxu0 %v3226_v40  ;;  %v760_v12 = vmin.f32 %v728_v62, 255.0  ;;  %v824_v47 = vmul.f32 %v3059_v11, %v791_v33  ;;  %v3377_v60 = vstv %s1731_s18  ;;  %v1305_v61 = vstv %s1732_s1 }
 0x109   : > { %v793_v48 = vsub.f32 %v761_v13, %v3056_v10  ;;  %v763_v42 = vmin.f32 %v731_v7, 255.0  ;;  %v823_v40 = vmul.f32 %v3059_v11, %v790_v44  ;;  %v762_v51 = vmin.f32 %v730_v58, 255.0 }
 0x10a   : > { %1111 = vmatmul.mubr.f32.gmra.mrb[22].mxu1 %v819_v3  ;;  %v792_v50 = vsub.f32 %v760_v12, %v3056_v10  ;;  %v3379_v1 = vstv %s1694_s13  ;;  %v3391_v46 = vstv %s3358_s17  ;;  %v1324_v28 = vstv %s3362_s15 }
 0x10b   : > { %1115 = vmatprep.mubr.f32.mxu1 %v822_v37  ;;  %577 = vmatmul.mubr.f32.gmra.mrb[22].mxu0 %v3229_v41  ;;  %v826_v52 = vmul.f32 %v3059_v11, %v793_v48  ;;  %v795_v20 = vsub.f32 %v763_v42, %v3056_v10  ;;  %v3400_v43 = vstv %s3360_s21 }
 0x10c   : > { %581 = vmatprep.mubr.f32.mxu0 %v3253_v25  ;;  %v825_v41 = vmul.f32 %v3059_v11, %v792_v50  ;;  %v794_v25 = vsub.f32 %v762_v51, %v3056_v10 }
 0x10d   : > { %v828_v53 = vmul.f32 %v3059_v11, %v795_v20 }
 0x10e   : > { %1116 = vmatmul.mubr.f32.gmra.mrb[24].mxu1 %v821_v6 }
 0x10f   : > { %1120 = vmatprep.mubr.f32.mxu1 %v824_v47  ;;  %582 = vmatmul.mubr.f32.gmra.mrb[24].mxu0 %v3256_v27  ;;  %v827_v27 = vmul.f32 %v3059_v11, %v794_v25  ;;  %v3354_v11 = vld [vmem:[%s374_s14] ss:$0 sm:$0xff] }
 0x110   : > { %586 = vmatprep.mubr.f32.mxu0 %v3263_v0 }
 0x112   : > { %1121 = vmatmul.mubr.f32.gmra.mrb[26].mxu1 %v823_v40 }
 0x113   : > { %1125 = vmatprep.mubr.f32.mxu1 %v826_v52  ;;  %587 = vmatmul.mubr.f32.gmra.mrb[26].mxu0 %v3266_v39 }
 0x114   : > { %591 = vmatprep.mubr.f32.mxu0 %v3283_v24  ;;  %v1267_v24 = vlaneseq }
 0x116   : > { %1126 = vmatmul.mubr.f32.gmra.mrb[28].mxu1 %v825_v41 }
 0x117   : > { %1130 = vmatprep.mubr.f32.mxu1 %v828_v53  ;;  %592 = vmatmul.mubr.f32.gmra.mrb[28].mxu0 %v3292_v56 }
 0x118   : > { %596 = vmatprep.mubr.f32.mxu0 %v3295_v57  ;;  %v3372_v57 = vshrl.u32 %v1267_v24, 7 }
 0x11a   : > { %1131 = vmatmul.mubr.f32.gmra.mrb[30].mxu1 %v827_v27  ;;  %v1269_v16 = vadd.s32 8, %v3372_v57  ;;  %v1270_v23 = vadd.s32 16, %v3372_v57  ;;  %v1286_v29 = vadd.s32 %v3377_v60, %v3372_v57  ;;  %v1271_v49 = vadd.s32 24, %v3372_v57 }
 0x11b   : > { %597 = vmatmul.mubr.f32.gmra.mrb[30].mxu0 %v3298_v21  ;;  %v1303_v21 = vand.u32 127, %v1267_v24  ;;  %v1272_v47 = vadd.s32 32, %v3372_v57  ;;  %v1273_v41 = vadd.s32 40, %v3372_v57 }
 0x11c   : > { %v3405_v37 = vadd.s32 %v3377_v60, %v1269_v16  ;;  %v3410_v7 = vadd.s32 %v3377_v60, %v1270_v23  ;;  %vm1308_vm0 = vcmp.lt.s32.totalorder %v1286_v29, %v3391_v46  ;;  %v3428_v20 = vadd.s32 %v3377_v60, %v1271_v49 }
 0x11d   : > { %v1306_v14 = vadd.s32 %v1305_v61, %v1303_v21  ;;  %v1276_v16 = vadd.s32 64, %v3372_v57 }
 0x11e   : > { %vm1309_vm2 = vcmp.lt.s32.totalorder %v3405_v37, %v3391_v46  ;;  %vm1310_vm3 = vcmp.lt.s32.totalorder %v3410_v7, %v3391_v46  ;;  %vm1311_vm5 = vcmp.lt.s32.totalorder %v3428_v20, %v3391_v46 }
 0x11f   : > { %vm3413_vm1 = vcmp.lt.s32.totalorder %v1306_v14, %v1324_v28 }
 0x120   : > { %vm3450_vm4 = vmand %vm1308_vm0, %vm3413_vm1 }
 0x121   : > { %vm3484_vm6 = vmand %vm1309_vm2, %vm3413_vm1 }
 0x122   : > { %vm1362_vm8 = vmand %vm1310_vm3, %vm3413_vm1 }
 0x123   : > { %vm3533_vm10 = vmand %vm1311_vm5, %vm3413_vm1 }
 0x1b1   : > { %v1856_v10 = vpop.f32.mrb[0].mxu1 }
 0x1b2   : > { %v1857_v0 = vpop.f32.mrb[1].mxu1  ;;  %v1776_v39 = vpop.f32.mrb[0].mxu0 }
 0x1b3   : > { %v1858_v45 = vadd.f32 %v1857_v0, %v1856_v10  ;;  %v1777_v54 = vpop.f32.mrb[1].mxu0 }
 0x1b4   : > { %v1778_v55 = vadd.f32 %v1777_v54, %v1776_v39  ;;  %v3439_v54 = vadd.s32 %v3377_v60, %v1272_v47 }
 0x1b5   : > { %v1058_v22 = vadd.f32 %v1858_v45, %v3354_v11  ;;  %v1859_v15 = vpop.f32.mrb[2].mxu1 }
 0x1b6   : > { %v1860_v8 = vpop.f32.mrb[3].mxu1  ;;  %v3370_v56 = vadd.f32 %v1778_v55, %v3354_v11  ;;  %v1779_v18 = vpop.f32.mrb[2].mxu0  ;;  %v1274_v55 = vadd.s32 48, %v3372_v57  ;;  %vm1312_vm7 = vcmp.lt.s32.totalorder %v3439_v54, %v3391_v46 }
 0x1b7   : > { %v1137_v26 = vmul.f32 %v3364_v31, %v1058_v22  ;;  %v1861_v59 = vadd.f32 %v1860_v8, %v1859_v15  ;;  %v1780_v63 = vpop.f32.mrb[3].mxu0  ;;  %v1275_v22 = vadd.s32 56, %v3372_v57  ;;  %vm3560_vm12 = vmand %vm1312_vm7, %vm3413_vm1 }
 0x1b8   : > { %1251 = vst [vmem:[%s3381_s20] sm:$0xff] %v3370_v56  ;;  %v1781_v2 = vadd.f32 %v1780_v63, %v1779_v18 }
 0x1b9   : > { %v2032_v32 = vround.rtne.f32 %v1137_v26  ;;  %v1063_v9 = vadd.f32 %v1861_v59, %v3354_v11  ;;  %v1862_v4 = vpop.f32.mrb[4].mxu1 }
 0x1ba   : > { %v1863_v5 = vpop.f32.mrb[5].mxu1  ;;  %v3394_v38 = vadd.f32 %v1781_v2, %v3354_v11  ;;  %v1782_v35 = vpop.f32.mrb[4].mxu0  ;;  %v3457_v2 = vadd.s32 %v3377_v60, %v1273_v41 }
 0x1bb   : > { %v1170_v17 = vadd.f32 %v2032_v32, %v3379_v1  ;;  %v1138_v19 = vmul.f32 %v3364_v31, %v1063_v9  ;;  %v1864_v3 = vadd.f32 %v1863_v5, %v1862_v4  ;;  %v1783_v30 = vpop.f32.mrb[5].mxu0 }
 0x1bc   : > { %1252 = vst [vmem:[%s3381_s20 + $0x8] sm:$0xff] %v3394_v38  ;;  %v1784_v34 = vadd.f32 %v1783_v30, %v1782_v35  ;;  %vm1313_vm9 = vcmp.lt.s32.totalorder %v3457_v2, %v3391_v46 }
 0x1bd   : > { %v1186_v36 = vmax.f32 %v1170_v17, 0.0  ;;  %v2033_v33 = vround.rtne.f32 %v1138_v19  ;;  %v1068_v13 = vadd.f32 %v1864_v3, %v3354_v11  ;;  %v1865_v62 = vpop.f32.mrb[6].mxu1  ;;  %v3469_v19 = vadd.s32 %v3377_v60, %v1274_v55  ;;  %vm1365_vm14 = vmand %vm1313_vm9, %vm3413_vm1 }
 0x1be   : > { %v1866_v6 = vpop.f32.mrb[7].mxu1  ;;  %v3418_v12 = vadd.f32 %v1784_v34, %v3354_v11  ;;  %v1785_v58 = vpop.f32.mrb[6].mxu0  ;;  %v3472_v3 = vadd.s32 %v3377_v60, %v1275_v22 }
 0x1bf   : > { %v1202_v48 = vmin.f32 %v1186_v36, 255.0  ;;  %v1171_v42 = vadd.f32 %v2033_v33, %v3379_v1  ;;  %v1139_v40 = vmul.f32 %v3364_v31, %v1068_v13  ;;  %v1867_v50 = vadd.f32 %v1866_v6, %v1865_v62  ;;  %v1786_v51 = vpop.f32.mrb[7].mxu0 }
 0x1c0   : > { %1253 = vst [vmem:[%s3381_s20 + $0x10] sm:$0xff] %v3418_v12  ;;  %v1787_v52 = vadd.f32 %v1786_v51, %v1785_v58  ;;  %v3491_v6 = vadd.s32 %v3377_v60, %v1276_v16  ;;  %v1278_v33 = vadd.s32 80, %v3372_v57  ;;  %vm1314_vm11 = vcmp.lt.s32.totalorder %v3469_v19, %v3391_v46 }
 0x1c1   : > { %v1187_v25 = vmax.f32 %v1171_v42, 0.0  ;;  %v2034_v53 = vround.rtne.f32 %v1139_v40  ;;  %v1073_v27 = vadd.f32 %v1867_v50, %v3354_v11  ;;  %v1218_v10 = vsub.f32 %v1202_v48, %v3379_v1  ;;  %v1868_v0 = vpop.f32.mrb[8].mxu1  ;;  %vm1366_vm0 = vmand %vm1314_vm11, %vm3413_vm1 }
 0x1c2   : > { %v1869_v39 = vpop.f32.mrb[9].mxu1  ;;  %v3436_v24 = vadd.f32 %v1787_v52, %v3354_v11  ;;  %v1788_v45 = vpop.f32.mrb[8].mxu0  ;;  %v1277_v40 = vadd.s32 72, %v3372_v57  ;;  %vm1315_vm13 = vcmp.lt.s32.totalorder %v3472_v3, %v3391_v46  ;;  %vm1316_vm15 = vcmp.lt.s32.totalorder %v3491_v6, %v3391_v46 }
 0x1c3   : > { %v1203_v15 = vmin.f32 %v1187_v25, 255.0  ;;  %v1172_v8 = vadd.f32 %v2034_v53, %v3379_v1  ;;  %v1140_v21 = vmul.f32 %v3364_v31, %v1073_v27  ;;  %v1235_v18 = vmul.f32 %v3400_v43, %v1218_v10  ;;  %v1789_v26 = vpop.f32.mrb[9].mxu0  ;;  %vm3626_vm3 = vmand %vm1315_vm13, %vm3413_vm1 }
 0x1c4   : > { %v1870_v61 = vadd.f32 %v1869_v39, %v1868_v0  ;;  %1254 = vst [vmem:[%s3381_s20 + $0x18] sm:$0xff] %v3436_v24  ;;  %v1790_v63 = vadd.f32 %v1789_v26, %v1788_v45  ;;  %v3518_v26 = vadd.s32 %v3377_v60, %v1277_v40  ;;  %vm1368_vm5 = vmand %vm1316_vm15, %vm3413_vm1 }
 0x1c5   : > { %v1188_v32 = vmax.f32 %v1172_v8, 0.0  ;;  %v2035_v9 = vround.rtne.f32 %v1140_v21  ;;  %v1376_v4 = vsub.f32 %v3370_v56, %v1235_v18  ;;  %v1219_v23 = vsub.f32 %v1203_v15, %v3379_v1  ;;  %v1871_v5 = vpop.f32.mrb[10].mxu1 }
 0x1c6   : > { %v1078_v29 = vadd.f32 %v1870_v61, %v3354_v11  ;;  %v1872_v14 = vpop.f32.mrb[11].mxu1  ;;  %v3466_v35 = vadd.f32 %v1790_v63, %v3354_v11  ;;  %v1791_v17 = vpop.f32.mrb[10].mxu0  ;;  %vm1317_vm2 = vcmp.lt.s32.totalorder %v3518_v26, %v3391_v46 }
 0x1c7   : > { %v1204_v56 = vmin.f32 %v1188_v32, 255.0  ;;  %v1173_v28 = vadd.f32 %v2035_v9, %v3379_v1  ;;  %v1392_v30 = vsel %vm3450_vm4, %v1376_v4, 0.0  ;;  %v1236_v34 = vmul.f32 %v3400_v43, %v1219_v23  ;;  %v1792_v49 = vpop.f32.mrb[11].mxu0  ;;  %vm1369_vm7 = vmand %vm1317_vm2, %vm3413_vm1 }
 0x1c8   : > { %v1141_v36 = vmul.f32 %v3364_v31, %v1078_v29  ;;  %v1873_v13 = vadd.f32 %v1872_v14, %v1871_v5  ;;  %1255 = vst [vmem:[%s3381_s20 + $0x20] sm:$0xff] %v3466_v35  ;;  %v1793_v62 = vadd.f32 %v1792_v49, %v1791_v17  ;;  %v1408_v37 = vmul.f32 %v1392_v30, %v1392_v30 }
 0x1c9   : > { %v1189_v58 = vmax.f32 %v1173_v28, 0.0  ;;  %v1377_v47 = vsub.f32 %v3394_v38, %v1236_v34  ;;  %v1220_v48 = vsub.f32 %v1204_v56, %v3379_v1  ;;  %v1874_v42 = vpop.f32.mrb[12].mxu1 }
 0x1ca   : > { %v2036_v50 = vround.rtne.f32 %v1141_v36  ;;  %v1083_v51 = vadd.f32 %v1873_v13, %v3354_v11  ;;  %v1875_v52 = vpop.f32.mrb[13].mxu1  ;;  %v3500_v41 = vadd.f32 %v1793_v62, %v3354_v11  ;;  %v1794_v25 = vpop.f32.mrb[12].mxu0 }
 0x1cb   : > { %v1205_v53 = vmin.f32 %v1189_v58, 255.0  ;;  %v1393_v38 = vsel %vm3484_vm6, %v1377_v47, 0.0  ;;  %v1237_v27 = vmul.f32 %v3400_v43, %v1220_v48  ;;  %v1876_v10 = vadd.f32 %v1875_v52, %v1874_v42  ;;  %v1795_v0 = vpop.f32.mrb[13].mxu0 }
 0x1cc   : > { %v1174_v39 = vadd.f32 %v2036_v50, %v3379_v1  ;;  %v1409_v45 = vmul.f32 %v1393_v38, %v1393_v38  ;;  %v1142_v55 = vmul.f32 %v3364_v31, %v1083_v51  ;;  %1256 = vst [vmem:[%s3381_s20 + $0x28] sm:$0xff] %v3500_v41  ;;  %v1796_v22 = vadd.f32 %v1795_v0, %v1794_v25 }
 0x1cd   : > { %v1378_v15 = vsub.f32 %v3418_v12, %v1237_v27  ;;  %v1088_v8 = vadd.f32 %v1876_v10, %v3354_v11  ;;  %v1221_v21 = vsub.f32 %v1205_v53, %v3379_v1  ;;  %v1877_v18 = vpop.f32.mrb[14].mxu1 }
 0x1ce   : > { %v1190_v59 = vmax.f32 %v1174_v39, 0.0  ;;  %v1440_v61 = vadd.f32 %v1409_v45, %v1408_v37  ;;  %v2037_v63 = vround.rtne.f32 %v1142_v55  ;;  %v1878_v16 = vpop.f32.mrb[15].mxu1  ;;  %v3523_v7 = vadd.f32 %v1796_v22, %v3354_v11  ;;  %v1797_v12 = vpop.f32.mrb[14].mxu0 }
 0x1cf   : > { %v1394_v32 = vsel %vm1362_vm8, %v1378_v15, 0.0  ;;  %v1143_v9 = vmul.f32 %v3364_v31, %v1088_v8  ;;  %v1238_v4 = vmul.f32 %v3400_v43, %v1221_v21  ;;  %v1879_v23 = vadd.f32 %v1878_v16, %v1877_v18  ;;  %v1798_v5 = vpop.f32.mrb[15].mxu0 }
 0x1d0   : > { %v1206_v29 = vmin.f32 %v1190_v59, 255.0  ;;  %v1175_v14 = vadd.f32 %v2037_v63, %v3379_v1  ;;  %v1410_v17 = vmul.f32 %v1394_v32, %v1394_v32  ;;  %1257 = vst [vmem:[%s3381_s20 + $0x30] sm:$0xff] %v3523_v7  ;;  %v1799_v28 = vadd.f32 %v1798_v5, %v1797_v12 }
 0x1d1   : > { %v2038_v30 = vround.rtne.f32 %v1143_v9  ;;  %v1379_v34 = vsub.f32 %v3436_v24, %v1238_v4  ;;  %v1093_v49 = vadd.f32 %v1879_v23, %v3354_v11  ;;  %v1880_v36 = vpop.f32.mrb[16].mxu1  ;;  %v1279_v45 = vadd.s32 88, %v3372_v57 }
 0x1d2   : > { %v1191_v13 = vmax.f32 %v1175_v14, 0.0  ;;  %v1441_v62 = vadd.f32 %v1440_v61, %v1410_v17  ;;  %v1222_v20 = vsub.f32 %v1206_v29, %v3379_v1  ;;  %v1881_v58 = vpop.f32.mrb[17].mxu1  ;;  %v3546_v47 = vadd.f32 %v1799_v28, %v3354_v11  ;;  %v1800_v48 = vpop.f32.mrb[16].mxu0 }
 0x1d3   : > { %v1176_v24 = vadd.f32 %v2038_v30, %v3379_v1  ;;  %v1395_v42 = vsel %vm3533_vm10, %v1379_v34, 0.0  ;;  %v1144_v40 = vmul.f32 %v3364_v31, %v1093_v49  ;;  %v1882_v37 = vadd.f32 %v1881_v58, %v1880_v36  ;;  %v1801_v50 = vpop.f32.mrb[17].mxu0 }
 0x1d4   : > { %v1207_v51 = vmin.f32 %v1191_v13, 255.0  ;;  %v1411_v52 = vmul.f32 %v1395_v42, %v1395_v42  ;;  %v1239_v25 = vmul.f32 %v3400_v43, %v1222_v20  ;;  %1258 = vst [vmem:[%s3381_s20 + $0x38] sm:$0xff] %v3546_v47  ;;  %v1802_v53 = vadd.f32 %v1801_v50, %v1800_v48 }
 0x1d5   : > { %v1192_v38 = vmax.f32 %v1176_v24, 0.0  ;;  %v2039_v27 = vround.rtne.f32 %v1144_v40  ;;  %v1098_v0 = vadd.f32 %v1882_v37, %v3354_v11  ;;  %v1883_v39 = vpop.f32.mrb[18].mxu1  ;;  %v3581_v9 = vadd.s32 %v3377_v60, %v1278_v33 }
 0x1d6   : > { %v1442_v55 = vadd.f32 %v1441_v62, %v1411_v52  ;;  %v1380_v22 = vsub.f32 %v3466_v35, %v1239_v25  ;;  %v1223_v15 = vsub.f32 %v1207_v51, %v3379_v1  ;;  %v1884_v8 = vpop.f32.mrb[19].mxu1  ;;  %v3571_v54 = vadd.f32 %v1802_v53, %v3354_v11  ;;  %v1803_v21 = vpop.f32.mrb[18].mxu0 }
 0x1d7   : > { %v1208_v18 = vmin.f32 %v1192_v38, 255.0  ;;  %v1177_v59 = vadd.f32 %v2039_v27, %v3379_v1  ;;  %v1145_v61 = vmul.f32 %v3364_v31, %v1098_v0  ;;  %v1885_v63 = vadd.f32 %v1884_v8, %v1883_v39  ;;  %v1804_v16 = vpop.f32.mrb[19].mxu0 }
 0x1d8   : > { %v1396_v12 = vsel %vm3560_vm12, %v1380_v22, 0.0  ;;  %v1240_v32 = vmul.f32 %v3400_v43, %v1223_v15  ;;  %1259 = vst [vmem:[%s3381_s20 + $0x40] sm:$0xff] %v3571_v54  ;;  %v1805_v35 = vadd.f32 %v1804_v16, %v1803_v21  ;;  %v3597_v49 = vadd.s32 %v3377_v60, %v1279_v45 }
 0x1d9   : > { %v1193_v4 = vmax.f32 %v1177_v59, 0.0  ;;  %v1412_v23 = vmul.f32 %v1396_v12, %v1396_v12  ;;  %v2040_v5 = vround.rtne.f32 %v1145_v61  ;;  %v1103_v29 = vadd.f32 %v1885_v63, %v3354_v11  ;;  %v1886_v14 = vpop.f32.mrb[20].mxu1 }
 0x1da   : > { %v1381_v17 = vsub.f32 %v3500_v41, %v1240_v32  ;;  %v1224_v56 = vsub.f32 %v1208_v18, %v3379_v1  ;;  %v1887_v28 = vpop.f32.mrb[21].mxu1  ;;  %v3594_v30 = vadd.f32 %v1805_v35, %v3354_v11  ;;  %v1806_v34 = vpop.f32.mrb[20].mxu0  ;;  %v1280_v27 = vadd.s32 96, %v3372_v57 }
 0x1db   : > { %v1209_v2 = vmin.f32 %v1193_v4, 255.0  ;;  %v1443_v36 = vadd.f32 %v1442_v55, %v1412_v23  ;;  %v1178_v33 = vadd.f32 %v2040_v5, %v3379_v1  ;;  %v1146_v13 = vmul.f32 %v3364_v31, %v1103_v29  ;;  %v1807_v62 = vpop.f32.mrb[21].mxu0 }
 0x1dc   : > { %v1397_v20 = vsel %vm1365_vm14, %v1381_v17, 0.0  ;;  %v1241_v41 = vmul.f32 %v3400_v43, %v1224_v56  ;;  %v1888_v58 = vadd.f32 %v1887_v28, %v1886_v14  ;;  %1260 = vst [vmem:[%s3381_s20 + $0x48] sm:$0xff] %v3594_v30  ;;  %v1808_v48 = vadd.f32 %v1807_v62, %v1806_v34 }
 0x1dd   : > { %v1194_v24 = vmax.f32 %v1178_v33, 0.0  ;;  %v1413_v42 = vmul.f32 %v1397_v20, %v1397_v20  ;;  %v2041_v40 = vround.rtne.f32 %v1146_v13  ;;  %v1225_v37 = vsub.f32 %v1209_v2, %v3379_v1  ;;  %v1889_v50 = vpop.f32.mrb[22].mxu1 }
 0x1de   : > { %v1382_v51 = vsub.f32 %v3523_v7, %v1241_v41  ;;  %v1108_v52 = vadd.f32 %v1888_v58, %v3354_v11  ;;  %v1890_v25 = vpop.f32.mrb[23].mxu1  ;;  %v3615_v53 = vadd.f32 %v1808_v48, %v3354_v11  ;;  %v1809_v38 = vpop.f32.mrb[22].mxu0  ;;  %vm1318_vm4 = vcmp.lt.s32.totalorder %v3581_v9, %v3391_v46 }
 0x1df   : > { %v1210_v19 = vmin.f32 %v1194_v24, 255.0  ;;  %v1444_v10 = vadd.f32 %v1443_v36, %v1413_v42  ;;  %v1179_v0 = vadd.f32 %v2041_v40, %v3379_v1  ;;  %v1242_v39 = vmul.f32 %v3400_v43, %v1225_v37  ;;  %v1810_v45 = vpop.f32.mrb[23].mxu0  ;;  %vm3693_vm9 = vmand %vm1318_vm4, %vm3413_vm1 }
 0x1e0   : > { %v1398_v55 = vsel %vm1366_vm0, %v1382_v51, 0.0  ;;  %v1147_v22 = vmul.f32 %v3364_v31, %v1108_v52  ;;  %v1891_v15 = vadd.f32 %v1890_v25, %v1889_v50  ;;  %1261 = vst [vmem:[%s3381_s20 + $0x50] sm:$0xff] %v3615_v53  ;;  %v1811_v8 = vadd.f32 %v1810_v45, %v1809_v38 }
 0x1e1   : > { %v1195_v21 = vmax.f32 %v1179_v0, 0.0  ;;  %v1414_v18 = vmul.f32 %v1398_v55, %v1398_v55  ;;  %v1383_v59 = vsub.f32 %v3546_v47, %v1242_v39  ;;  %v1226_v61 = vsub.f32 %v1210_v19, %v3379_v1  ;;  %v1892_v63 = vpop.f32.mrb[24].mxu1 }
 0x1e2   : > { %v2042_v16 = vround.rtne.f32 %v1147_v22  ;;  %v1113_v12 = vadd.f32 %v1891_v15, %v3354_v11  ;;  %v1893_v3 = vpop.f32.mrb[25].mxu1  ;;  %v3638_v32 = vadd.f32 %v1811_v8, %v3354_v11  ;;  %v1812_v35 = vpop.f32.mrb[24].mxu0  ;;  %v3641_v4 = vadd.s32 %v3377_v60, %v1280_v27 }
 0x1e3   : > { %v1211_v23 = vmin.f32 %v1195_v21, 255.0  ;;  %v1445_v47 = vadd.f32 %v1444_v10, %v1414_v18  ;;  %v1399_v5 = vsel %vm3626_vm3, %v1383_v59, 0.0  ;;  %v1243_v29 = vmul.f32 %v3400_v43, %v1226_v61  ;;  %v1813_v14 = vpop.f32.mrb[25].mxu0 }
 0x1e4   : > { %v1180_v17 = vadd.f32 %v2042_v16, %v3379_v1  ;;  %v1415_v56 = vmul.f32 %v1399_v5, %v1399_v5  ;;  %v1148_v28 = vmul.f32 %v3364_v31, %v1113_v12  ;;  %v1894_v34 = vadd.f32 %v1893_v3, %v1892_v63  ;;  %1262 = vst [vmem:[%s3381_s20 + $0x58] sm:$0xff] %v3638_v32 }
 0x1e5   : > { %v1384_v2 = vsub.f32 %v3571_v54, %v1243_v29  ;;  %v1227_v36 = vsub.f32 %v1211_v23, %v3379_v1  ;;  %v1895_v33 = vpop.f32.mrb[26].mxu1  ;;  %v1814_v13 = vadd.f32 %v1813_v14, %v1812_v35  ;;  %v1281_v62 = vadd.s32 104, %v3372_v57 }
 0x1e6   : > { %v1196_v20 = vmax.f32 %v1180_v17, 0.0  ;;  %v1446_v41 = vadd.f32 %v1445_v47, %v1415_v56  ;;  %v2043_v58 = vround.rtne.f32 %v1148_v28  ;;  %v1118_v48 = vadd.f32 %v1894_v34, %v3354_v11  ;;  %v1896_v24 = vpop.f32.mrb[27].mxu1  ;;  %v1815_v6 = vpop.f32.mrb[26].mxu0 }
 0x1e7   : > { %vm1319_vm6 = vcmp.lt.s32.totalorder %v3597_v49, %v3391_v46  ;;  %v1400_v42 = vsel %vm1368_vm5, %v1384_v2, 0.0  ;;  %v1244_v54 = vmul.f32 %v3400_v43, %v1227_v36  ;;  %v1897_v40 = vadd.f32 %v1896_v24, %v1895_v33  ;;  %v1816_v50 = vpop.f32.mrb[27].mxu0 }
 0x1e8   : > { %v3663_v37 = vadd.f32 %v1814_v13, %v3354_v11  ;;  %v1212_v51 = vmin.f32 %v1196_v20, 255.0  ;;  %v1181_v52 = vadd.f32 %v2043_v58, %v3379_v1  ;;  %v1416_v25 = vmul.f32 %v1400_v42, %v1400_v42  ;;  %vm1371_vm10 = vmand %vm1319_vm6, %vm3413_vm1 }
 0x1e9   : > { %v1149_v38 = vmul.f32 %v3364_v31, %v1118_v48  ;;  %v1385_v27 = vsub.f32 %v3594_v30, %v1244_v54  ;;  %v1123_v19 = vadd.f32 %v1897_v40, %v3354_v11  ;;  %v1898_v10 = vpop.f32.mrb[28].mxu1  ;;  %v1817_v0 = vadd.f32 %v1816_v50, %v1815_v6 }
 0x1ea   : > { %1263 = vst [vmem:[%s3381_s20 + $0x60] sm:$0xff] %v3663_v37  ;;  %v3677_v39 = vadd.s32 %v3377_v60, %v1281_v62  ;;  %v1197_v45 = vmax.f32 %v1181_v52, 0.0  ;;  %v1447_v55 = vadd.f32 %v1446_v41, %v1416_v25  ;;  %v1228_v7 = vsub.f32 %v1212_v51, %v3379_v1  ;;  %v1899_v15 = vpop.f32.mrb[29].mxu1  ;;  %v1818_v26 = vpop.f32.mrb[28].mxu0 }
 0x1eb   : > { %v2044_v22 = vround.rtne.f32 %v1149_v38  ;;  %vm1320_vm8 = vcmp.lt.s32.totalorder %v3641_v4, %v3391_v46  ;;  %v1401_v30 = vsel %vm1369_vm7, %v1385_v27, 0.0  ;;  %v1150_v8 = vmul.f32 %v3364_v31, %v1123_v19  ;;  %v1819_v59 = vpop.f32.mrb[29].mxu0 }
 0x1ec   : > { %v1900_v21 = vadd.f32 %v1899_v15, %v1898_v10  ;;  %v3684_v18 = vadd.f32 %v1817_v0, %v3354_v11  ;;  %v1213_v61 = vmin.f32 %v1197_v45, 255.0  ;;  %v1417_v16 = vmul.f32 %v1401_v30, %v1401_v30  ;;  %vm1372_vm12 = vmand %vm1320_vm8, %vm3413_vm1 }
 0x1ed   : > { %v1182_v63 = vadd.f32 %v2044_v22, %v3379_v1  ;;  %v1245_v12 = vmul.f32 %v3400_v43, %v1228_v7  ;;  %v2045_v3 = vround.rtne.f32 %v1150_v8  ;;  %v1901_v47 = vpop.f32.mrb[30].mxu1  ;;  %v1820_v5 = vadd.f32 %v1819_v59, %v1818_v26 }
 0x1ee   : > { %v1128_v23 = vadd.f32 %v1900_v21, %v3354_v11  ;;  %1264 = vst [vmem:[%s3381_s20 + $0x68] sm:$0xff] %v3684_v18  ;;  %v1282_v29 = vadd.s32 112, %v3372_v57  ;;  %v1448_v17 = vadd.f32 %v1447_v55, %v1417_v16  ;;  %v1229_v28 = vsub.f32 %v1213_v61, %v3379_v1  ;;  %v1902_v34 = vpop.f32.mrb[31].mxu1  ;;  %v1821_v9 = vpop.f32.mrb[30].mxu0 }
 0x1ef   : > { %v1198_v14 = vmax.f32 %v1182_v63, 0.0  ;;  %v1386_v56 = vsub.f32 %v3615_v53, %v1245_v12  ;;  %v1183_v2 = vadd.f32 %v2045_v3, %v3379_v1  ;;  %v1903_v33 = vadd.f32 %v1902_v34, %v1901_v47  ;;  %v1822_v62 = vpop.f32.mrb[31].mxu0 }
 0x1f0   : > { %v1151_v36 = vmul.f32 %v3364_v31, %v1128_v23  ;;  %v594_v13 = vadd.f32 %v1820_v5, %v3354_v11  ;;  %v1246_v58 = vmul.f32 %v3400_v43, %v1229_v28  ;;  %v1823_v53 = vadd.f32 %v1822_v62, %v1821_v9 }
 0x1f1   : > { %v1214_v20 = vmin.f32 %v1198_v14, 255.0  ;;  %v1402_v41 = vsel %vm3693_vm9, %v1386_v56, 0.0  ;;  %v1199_v48 = vmax.f32 %v1183_v2, 0.0  ;;  %v1133_v42 = vadd.f32 %v1903_v33, %v3354_v11 }
 0x1f2   : > { %v1418_v24 = vmul.f32 %v1402_v41, %v1402_v41  ;;  %v2046_v6 = vround.rtne.f32 %v1151_v36  ;;  %1265 = vst [vmem:[%s3381_s20 + $0x70] sm:$0xff] %v594_v13  ;;  %v1387_v54 = vsub.f32 %v3638_v32, %v1246_v58  ;;  %vm1321_vm11 = vcmp.lt.s32.totalorder %v3677_v39, %v3391_v46 }
 0x1f3   : > { %v1230_v40 = vsub.f32 %v1214_v20, %v3379_v1  ;;  %v599_v50 = vadd.f32 %v1823_v53, %v3354_v11  ;;  %v1215_v51 = vmin.f32 %v1199_v48, 255.0  ;;  %v1152_v38 = vmul.f32 %v3364_v31, %v1133_v42  ;;  %vm1373_vm13 = vmand %vm1321_vm11, %vm3413_vm1 }
 0x1f4   : > { %v1449_v52 = vadd.f32 %v1448_v17, %v1418_v24  ;;  %v1184_v25 = vadd.f32 %v2046_v6, %v3379_v1  ;;  %v1403_v49 = vsel %vm1371_vm10, %v1387_v54, 0.0  ;;  %v1300_v19 = vadd.s32 %v3377_v60, %v1282_v29 }
 0x1f5   : > { %v1247_v27 = vmul.f32 %v3400_v43, %v1230_v40  ;;  %1266 = vst [vmem:[%s3381_s20 + $0x78] sm:$0xff] %v599_v50  ;;  %v1283_v32 = vadd.s32 120, %v3372_v57  ;;  %v1419_v0 = vmul.f32 %v1403_v49, %v1403_v49  ;;  %v2047_v45 = vround.rtne.f32 %v1152_v38 }
 0x1f6   : > { %v1200_v10 = vmax.f32 %v1184_v25, 0.0  ;;  %v1231_v11 = vsub.f32 %v1215_v51, %v3379_v1  ;;  %vm1322_vm14 = vcmp.lt.s32.totalorder %v1300_v19, %v3391_v46 }
 0x1f7   : > { %v1388_v31 = vsub.f32 %v3663_v37, %v1247_v27  ;;  %v1450_v22 = vadd.f32 %v1449_v52, %v1419_v0  ;;  %v1185_v7 = vadd.f32 %v2047_v45, %v3379_v1  ;;  %v1301_v4 = vadd.s32 %v3377_v60, %v1283_v32  ;;  %vm1374_vm15 = vmand %vm1322_vm14, %vm3413_vm1 }
 0x1f8   : > { %v1216_v55 = vmin.f32 %v1200_v10, 255.0  ;;  %v1248_v15 = vmul.f32 %v3400_v43, %v1231_v11 }
 0x1f9   : > { %v1404_v57 = vsel %vm1372_vm12, %v1388_v31, 0.0  ;;  %v1201_v26 = vmax.f32 %v1185_v7, 0.0  ;;  %vm1323_vm0 = vcmp.lt.s32.totalorder %v1301_v4, %v3391_v46 }
 0x1fa   : > { %v1420_v30 = vmul.f32 %v1404_v57, %v1404_v57  ;;  %v1389_v37 = vsub.f32 %v3684_v18, %v1248_v15  ;;  %v1232_v8 = vsub.f32 %v1216_v55, %v3379_v1  ;;  %vm1375_vm2 = vmand %vm1323_vm0, %vm3413_vm1 }
 0x1fb   : > { %v1217_v21 = vmin.f32 %v1201_v26, 255.0 }
 0x1fc   : > { %v1451_v59 = vadd.f32 %v1450_v22, %v1420_v30  ;;  %v1405_v61 = vsel %vm1373_vm13, %v1389_v37, 0.0  ;;  %v1249_v63 = vmul.f32 %v3400_v43, %v1232_v8 }
 0x1fd   : > { %v1421_v16 = vmul.f32 %v1405_v61, %v1405_v61  ;;  %v1233_v12 = vsub.f32 %v1217_v21, %v3379_v1  ;;  %v2504_v1 = vmov (!%p1733_p0), 0.0  }
 0x1fe   : > { %v1390_v39 = vsub.f32 %v594_v13, %v1249_v63  ;;  %1459 = vst [vmem:[%s3755_s27] sm:$0xff] (!%p1733_p0), %v2504_v1 }
 0x1ff   : > { %v1452_v60 = vadd.f32 %v1451_v59, %v1421_v16  ;;  %v1250_v18 = vmul.f32 %v3400_v43, %v1233_v12 }
 0x200   : > { %v1406_v3 = vsel %vm1374_vm15, %v1390_v39, 0.0  ;;  %1458 = sbr.rel (%p1733_p0) target bundleno = 519 (0x207), region = 60 }
 0x201   : > { %v1422_v35 = vmul.f32 %v1406_v3, %v1406_v3  ;;  %v1391_v23 = vsub.f32 %v599_v50, %v1250_v18 }
 0x203   : > { %v1453_v47 = vadd.f32 %v1452_v60, %v1422_v35  ;;  %v1407_v5 = vsel %vm1375_vm2, %v1391_v23, 0.0 }
 0x204   : > { %v1423_v29 = vmul.f32 %v1407_v5, %v1407_v5 }
 0x206   : > { %v1454_v14 = vadd.f32 %v1453_v47, %v1423_v29 }
 0x207 PF: > { %s3972_s8 = sld [smem:[#allocation22_spill]]  ;;  %s3973_s7 = sld [smem:[#allocation25_spill]]  ;;  %v1460_v46 = vld [vmem:[%s3755_s27] sm:$0xff] }
 0x208   : > { %v1461_v43 = vadd.f32 %v1460_v46, %v1454_v14  ;;  %s1484_s24 = sshll.u32 %s3381_s20, 4  ;;  %s3974_s2 = sld [smem:[#allocation37_spill]]  ;;  %s3763_s24 = int_to_ptr.vmem [resolvable:$true] %s1484_s24 }
 0x209   : > { %s3773_s21 = scalar_lea.sflag [#allocation4], %s361_s0  ;;  %s2303_s15 = scalar_lea.vmem %s3763_s24, 2048 }
 0x20a   : > { %1462 = vst [vmem:[%s3755_s27] sm:$0xff] %v1461_v43  ;;  %p2304_p4 = scmp.ne.s32.totalorder %s3763_s24, %s2303_s15 }
 0x20d   : > { %s2048_s19 = smul.u32 48, %s3972_s8  ;;  %p3975_p5 = scmp.ne.s32.totalorder %s3973_s7, 0 }
 0x20f   : > { %s1481_s16 = sadd.s32 %s2477_s30, %s2048_s19  ;;  %p2305_p12 = pnand %p2304_p4, %p3975_p5 }
 0x210   : > { %s1738_s14 = sshll.u32 %s1481_s16, 7  ;;  %s2505_s30 = smov [#allocation11]  }
 0x211   : > { %s3769_s17 = scalar_lea.hbm %s3974_s2, %s1738_s14  ;;  %p2306_p7 = pneg %p2305_p12 }
 0x212   : > { %s2307_s1 = sshll.u32 %s2505_s30, 4  ;;  %s2308_s1 = int_to_ptr.vmem [resolvable:$false] %s2307_s1 }
 0x213   : > { %s2309_s20 = scalar_lea.vmem %s2308_s1, 4096  ;;  %p2310_p8 = scmp.lt.s32.totalorder %s3763_s24, %s2308_s1 }
 0x214   : > { %p2311_p11 = scmp.lt.s32.totalorder %s2309_s20, %s2303_s15 }
 0x216   : > { %p2312_p3 = por %p2311_p11, %p2310_p8 }
 0x218   : > { %p2313_p1 = pnand %p2312_p3, %p2306_p7 }
 0x21a   : > { %2316 = shalt.err (!%p2313_p1)
}
 0x21b   : > { %s2317_s0 = scalar_lea.hbm %s3769_s17, 2048  ;;  %s2321_s14 = scalar_lea.hbm %s3974_s2, 12288 }
 0x21c   : > { %p2318_p6 = scmp.ne.s32.totalorder %s3769_s17, %s2317_s0  ;;  %p2322_p10 = scmp.lt.u32.totalorder %s3769_s17, %s3974_s2 }
 0x21d   : > { %p2323_p9 = scmp.lt.u32.totalorder %s2321_s14, %s2317_s0  ;;  %p2325_p4 = scmp.lt.u32.totalorder %s2317_s0, %s3769_s17 }
 0x21e   : > { %p2319_p13 = pnand %p2318_p6, %p3975_p5 }
 0x21f   : > { %p2324_p0 = por %p2323_p9, %p2322_p10 }
 0x220   : > { %p2320_p2 = pneg %p2319_p13 }
 0x221   : > { %p2326_p12 = por %p2325_p4, %p2324_p0 }
 0x223   : > { %p2327_p7 = pnand %p2326_p12, %p2320_p2 }
 0x225   : > { %2330 = shalt.err (!%p2327_p7)
}
 0x226   : > { %s2506_s15 = smov 128   ;;  %s3976_s30 = sld [smem:[#allocation28_spill]] }
 0x227   : > { %s2507_s1 = smov 384   ;;  %s2508_s20 = smov 8  }
 0x228   : > { %2061 = dma.vmem_to_hbm [thread:$0]  (%p3975_p5), %s3763_s24, 2048, %s3769_s17, %s3773_s21, %s2506_s15, %s2507_s1, %s2508_s20  }
 0x229   : > { %s3977_s0 = sld [smem:[#allocation38_spill]]  ;;  %s1500_s11 = sshll.u32 %s3755_s27, 4  ;;  %s1501_s11 = int_to_ptr.vmem [resolvable:$true] %s1500_s11 }
 0x22a   : > { %s1469_s13 = scalar_lea.sflag [#allocation13], %s2851_s12  ;;  %s2331_s2 = scalar_lea.vmem %s1501_s11, 128 }
 0x22b   : > { %p2332_p8 = scmp.ne.s32.totalorder %s1501_s11, %s2331_s2  ;;  %s2509_s3 = smov [#allocation12]  }
 0x22c   : > { %p3978_p11 = scmp.ne.s32.totalorder %s3976_s30, 0  ;;  %s2335_s9 = sshll.u32 %s2509_s3, 4  ;;  %s2336_s9 = int_to_ptr.vmem [resolvable:$false] %s2335_s9 }
 0x22d   : > { %s2337_s5 = scalar_lea.vmem %s2336_s9, 256  ;;  %p2338_p6 = scmp.lt.s32.totalorder %s1501_s11, %s2336_s9 }
 0x22e   : > { %p2333_p3 = pnand %p2332_p8, %p3978_p11  ;;  %p2339_p5 = scmp.lt.s32.totalorder %s2337_s5, %s2331_s2 }
 0x22f   : > { %s3802_s14 = scalar_lea.hbm %s3977_s0, %s1731_s18 }
 0x230   : > { %p2334_p1 = pneg %p2333_p3  ;;  %p2340_p13 = por %p2339_p5, %p2338_p6 }
 0x232   : > { %p2341_p2 = pnand %p2340_p13, %p2334_p1 }
 0x234   : > { %2344 = shalt.err (!%p2341_p2)
}
 0x235   : > { %s2345_s12 = scalar_lea.hbm %s3802_s14, 128  ;;  %s2349_s3 = scalar_lea.hbm %s3977_s0, 256 }
 0x236   : > { %p2346_p10 = scmp.ne.s32.totalorder %s3802_s14, %s2345_s12  ;;  %p2350_p4 = scmp.lt.u32.totalorder %s3802_s14, %s3977_s0 }
 0x237   : > { %p2351_p12 = scmp.lt.u32.totalorder %s2349_s3, %s2345_s12  ;;  %p2353_p8 = scmp.lt.u32.totalorder %s2345_s12, %s3802_s14 }
 0x238   : > { %p2347_p9 = pnand %p2346_p10, %p3978_p11 }
 0x239   : > { %p2352_p7 = por %p2351_p12, %p2350_p4 }
 0x23a   : > { %p2348_p0 = pneg %p2347_p9 }
 0x23b   : > { %p2354_p3 = por %p2353_p8, %p2352_p7 }
 0x23d   : > { %p2355_p1 = pnand %p2354_p3, %p2348_p0 }
 0x23f   : > { %2358 = shalt.err (!%p2355_p1)
}
 0x240   : > { %2062 = dma.vmem_to_hbm [thread:$0]  (%p3978_p11), %s1501_s11, 128, %s3802_s14, %s1469_s13  }
 0x241 PF: > { %s3979_s5 = sld [smem:[#allocation20_spill]]  ;;  %s3980_s7 = sld [smem:[#allocation26_spill]] }
 0x242   : > { %p2091_p6 = scmp.ge.s32.totalorder %s2493_s10, 2 }
 0x247   : > { %s1512_s24 = sand.u32 1, %s3979_s5   ;;  %p3981_p5 = scmp.ne.s32.totalorder %s3980_s7, 0 }
 0x248   : > { %s1513_s2 = scalar_lea.sflag [#allocation4], %s1512_s24 }
 0x249   : > { %p2080_p13 = pnand %p2091_p6, %p3981_p5 }
 0x24b   : > { %2432 = dma.done.wait (!%p2080_p13), %s1513_s2, 2048  }
 0x24c   : > { %2434 = vsyncadd (!%p2080_p13), %s1513_s2, 4294965248  ;;  %s3982_s17 = sld [smem:[#allocation21_spill]]  ;;  %s3983_s21 = sld [smem:[#allocation27_spill]] }
 0x252   : > { %s1521_s15 = sand.u32 1, %s3982_s17   ;;  %p3984_p2 = scmp.ne.s32.totalorder %s3983_s21, 0 }
 0x253   : > { %s1522_s1 = scalar_lea.sflag [#allocation13], %s1521_s15 }
 0x254   : > { %p2083_p10 = pnand %p2091_p6, %p3984_p2 }
 0x256   : > { %2436 = dma.done.wait (!%p2083_p10), %s1522_s1, 128  }
 0x257   : > { %2438 = vsyncadd (!%p2083_p10), %s1522_s1, 4294967168  ;;  %s31_s10 = sadd.s32 1, %s2493_s10   ;;  %s3986_s20 = sld [smem:[#allocation31_spill]] }
 0x258   : > { %p3831_p11 = scmp.ge.s32.totalorder %s31_s10, 8   ;;  %s3987_s19 = sld [smem:[#allocation23_spill]] }
 0x259   : > { %s3988_s7 = sld [smem:[#allocation24_spill]]  ;;  %s3989_s8 = sld [smem:[#allocation29_spill]] }
 0x25a   : > { %s3990_s9 = sld [smem:[#allocation30_spill]]  ;;  %s3992_s21 = smov %s2445_s22 }
 0x25b   : > { %s3993_s22 = smov %s2449_s23  ;;  %s3994_s23 = smov %s2800_s4 }
 0x25c   : > { %s3995_s24 = smov %s2457_s25  ;;  %s3996_s25 = smov %s2461_s26 }
 0x25d   : > { %s3997_s26 = smov %s2783_s6  ;;  %s3998_s27 = smov %s2469_s28 }
 0x25e   : > { %s3999_s28 = smov %s2473_s29  ;;  %s4000_s29 = smov %s3986_s20 }
 0x25f   : > { %s4001_s30 = smov %s3987_s19  ;;  %30 = sbr.rel (!%p3831_p11) target bundleno = 24 (0x18), region = 132 }
 0x266   :  { %1527 = vsyncpa [#allocation3], 1 }
 0x267   :  { %1529 = vsyncpa [#allocation3 + $0x1], 1 }
 0x268   :  { %1530 = vsyncpa [#allocation10], 1 }
 0x269   :  { %1532 = vsyncpa [#allocation10 + $0x1], 1 }
 0x26a   :  { %1533 = vsyncpa [#allocation4], 1 }
 0x26b   :  { %1535 = vsyncpa [#allocation4 + $0x1], 1 }
 0x26c   :  { %1536 = vsyncpa [#allocation13], 1 }
 0x26d   :  { %1538 = vsyncpa [#allocation13 + $0x1], 1 }
 0x26e   :  { %1539 = vsyncpa [#allocation5], 1 }
 0x26f   :  { %1541 = vsyncpa [#allocation5 + $0x1], 1 }
 0x270   :  { %1542 = vsyncpa [#allocation6], 1 }
 0x271   :  { %1544 = vsyncpa [#allocation6 + $0x1], 1 }

</bundles_post_ra>
